<compile_context>
chip_gen: v7x
topology: tpu7x:2x2x1
jax: 0.10.0
libtpu: 0.0.40
codegen_flags: <defaults>
</compile_context>

<pallas_src>
import functools
import math

import jax
import jax.numpy as jnp
from jax import lax
from jax.experimental import pallas as pl
from jax.experimental.pallas import tpu as pltpu


def _layernorm(x, gamma, beta, eps):
    # TF-style layernorm: eps inside the sqrt; biased variance (mean of squares).
    u = jnp.mean(x, axis=-1, keepdims=True)
    s = jnp.mean((x - u) ** 2, axis=-1, keepdims=True)
    return gamma * ((x - u) * lax.rsqrt(s + eps)) + beta


def _gelu(x, approximate=False):
    if approximate:
        # tanh approximation -> EUP slot (frees the VALU on v5e if it saturates).
        c = math.sqrt(2.0 / math.pi)
        return 0.5 * x * (1.0 + jnp.tanh(c * (x + 0.044715 * x * x * x)))
    # x * 0.5 * (1 + erf(x / sqrt(2)))  -- exact (erf) gelu, as in the module.
    return x * 0.5 * (1.0 + lax.erf(x * (1.0 / math.sqrt(2.0))))


def _transformer_body(
    x_ref, mask_ref,
    wq_ref, bq_ref, wk_ref, bk_ref, wv_ref, bv_ref,
    wo_ref, bo_ref, g1_ref, be1_ref,
    w1_ref, b1_ref, w2_ref, b2_ref, g2_ref, be2_ref,
    out_ref, k_cache, v_cache,
    *, num_heads, head_dim, block_q, eps,
    compute_dtype, approx_gelu, approx_recip,
):
    cd = compute_dtype
    f32 = jnp.float32
    qi = pl.program_id(1)
    seq_len = x_ref.shape[1]

    # ---- K / V projections: computed ONCE per batch element (first query tile)
    #      and cached in persistent VMEM scratch in compute_dtype. ------------
    @pl.when(qi == 0)
    def _():
        x_all = x_ref[0].astype(cd)                                    # (S, H)
        k = jnp.dot(x_all, wk_ref[...], preferred_element_type=f32)
        k = k + bk_ref[...].astype(f32)
        v = jnp.dot(x_all, wv_ref[...], preferred_element_type=f32)
        v = v + bv_ref[...].astype(f32)
        k_cache[...] = k.astype(cd)                                    # (S, H) cd
        v_cache[...] = v.astype(cd)

    # Query tile / residual stream: sliced out of the resident x block
    # (no separate x_q input / DMA).
    start = pl.multiple_of(qi * block_q, block_q)
    x_q = x_ref[0, pl.ds(start, block_q), :].astype(f32)               # (TQ, H)

    if mask_ref is not None:
        mask = mask_ref[0, 0].astype(f32)                              # (TQ, S)
    else:
        # In-kernel causal additive mask (0 allowed / -1e9 masked): removes the
        # (B, 1, S, S) mask stream from HBM entirely.
        rows = start + lax.broadcasted_iota(jnp.int32, (block_q, seq_len), 0)
        cols = lax.broadcasted_iota(jnp.int32, (block_q, seq_len), 1)
        mask = jnp.where(cols <= rows, 0.0, -1e9).astype(f32)

    bq = bq_ref[...].astype(f32)
    bo = bo_ref[...].astype(f32)
    b1 = b1_ref[...].astype(f32)
    b2 = b2_ref[...].astype(f32)
    g1, be1 = g1_ref[...].astype(f32), be1_ref[...].astype(f32)
    g2, be2 = g2_ref[...].astype(f32), be2_ref[...].astype(f32)

    wo = wo_ref[...]                                                   # (H, H) cd
    k_all = k_cache[...]                                               # (S, H) cd
    v_all = v_cache[...]                                               # (S, H) cd

    # ---- Multi-head self-attention (cd operands on the MXU, f32 accumulate) -
    q = jnp.dot(x_q.astype(cd), wq_ref[...], preferred_element_type=f32) + bq
    scale = 1.0 / math.sqrt(head_dim)
    attn = None
    for h in range(num_heads):                     # static, small unrolled loop
        lo = h * head_dim
        qh = q[:, lo:lo + head_dim].astype(cd)                         # (TQ, dh)
        kh = k_all[:, lo:lo + head_dim]                                # (S,  dh)
        vh = v_all[:, lo:lo + head_dim]                                # (S,  dh)
        # q @ k^T without materializing a transpose: contract head_dim of both.
        s = lax.dot_general(qh, kh, dimension_numbers=(((1,), (1,)), ((), ())),
                            preferred_element_type=f32) * scale + mask  # (TQ, S)
        s = s - jnp.max(s, axis=-1, keepdims=True)
        p = jnp.exp(s)
        denom = jnp.sum(p, axis=-1, keepdims=True)
        if approx_recip:
            p = p * pl.reciprocal(denom, approx=True)                  # EUP slot
        else:
            p = p / denom                                              # exact f32
        ctx_h = jnp.dot(p.astype(cd), vh, preferred_element_type=f32)  # (TQ, dh)
        # Fused output projection: lane-dense (TQ, H) MXU result per head; no
        # lane-masked (TQ, dh) store and no ctx scratch round-trip.
        part = jnp.dot(ctx_h.astype(cd), wo[lo:lo + head_dim, :],
                       preferred_element_type=f32)                     # (TQ, H)
        attn = part if attn is None else attn + part

    h1 = _layernorm(attn + bo + x_q, g1, be1, eps)                     # (TQ, H)

    # ---- Feed-forward --------------------------------------------------------
    ffn_inner = jnp.dot(h1.astype(cd), w1_ref[...],
                        preferred_element_type=f32) + b1               # (TQ, 4H)
    ffn_inner = _gelu(ffn_inner, approximate=approx_gelu)
    ffn = jnp.dot(ffn_inner.astype(cd), w2_ref[...],
                  preferred_element_type=f32) + b2                     # (TQ, H)
    out = _layernorm(ffn + h1, g2, be2, eps)

    out_ref[0] = out.astype(out_ref.dtype)


def _make_kernel(*, has_mask, **static):
    body = functools.partial(_transformer_body, **static)
    if has_mask:
        def kernel(x_ref, mask_ref, *rest):
            body(x_ref, mask_ref, *rest)
    else:
        def kernel(x_ref, *rest):
            body(x_ref, None, *rest)
    return kernel


def prepare_params(params, compute_dtype=jnp.bfloat16):
    """Cast the matmul weights to compute_dtype ONCE at parameter-load time.

    Biases and LayerNorm params stay in their original (f32) dtype.
    """
    (wq, bq, wk, bk, wv, bv, wo, bo, g1, be1, w1, b1, w2, b2, g2, be2) = params
    c = lambda w: w.astype(compute_dtype)
    return (c(wq), bq, c(wk), bk, c(wv), bv, c(wo), bo,
            g1, be1, c(w1), b1, c(w2), b2, g2, be2)


def transformer_block(x, mask, params, *, num_heads, eps=1e-12, block_q=None,
                      compute_dtype=jnp.bfloat16, causal=False,
                      vmem_limit_bytes=None, single_buffer_weights=True,
                      approx_gelu=False, approx_softmax_reciprocal=True):
    """TransformerBlock forward (inference).  mask may be None when causal=True."""
    B, S, H = x.shape
    assert H % num_heads == 0, "hidden_size must be divisible by num_heads"
    head_dim = H // num_heads
    inner_size = 4 * H

    if block_q is None:
        # Guidance: v5e 128-256 (128-wide MXU); v6e 256-512 (+~96-110 MiB
        # vmem_limit_bytes); v7x 128 with an explicit ~48 MiB budget.
        block_q = min(S, 256)
    assert S % block_q == 0, "block_q must divide the sequence length"
    n_q = S // block_q

    has_mask = mask is not None
    if not has_mask and not causal:
        raise ValueError("provide an attention_mask or set causal=True")

    (wq, bq, wk, bk, wv, bv, wo, bo, g1, be1, w1, b1, w2, b2, g2, be2) = params
    # Weights should already be in compute_dtype via prepare_params(); cast only
    # if the caller skipped that (avoids a per-call HBM round trip otherwise).
    c = lambda w: w if w.dtype == compute_dtype else w.astype(compute_dtype)
    params_c = (c(wq), bq, c(wk), bk, c(wv), bv, c(wo), bo,
                g1, be1, c(w1), b1, c(w2), b2, g2, be2)

    def full_spec(shape):
        zeros = (0,) * len(shape)
        kw = {}
        if single_buffer_weights:
            # Constant index map -> DMA'd once; double-buffering only burns VMEM.
            kw["pipeline_mode"] = pl.Buffered(1)
        return pl.BlockSpec(shape, lambda b, q, _z=zeros: _z, **kw)

    # x is resident per batch element (index map constant across q -> DMA'd once
    # per b); both the query tile and the K/V source are sliced from it.
    in_specs = [pl.BlockSpec((1, S, H), lambda b, q: (b, 0, 0))]
    inputs = [x]
    if has_mask:
        in_specs.append(pl.BlockSpec((1, 1, block_q, S), lambda b, q: (b, 0, q, 0)))
        inputs.append(mask)
    in_specs += [
        full_spec((H, H)), full_spec((1, H)),               # wq, bq
        full_spec((H, H)), full_spec((1, H)),               # wk, bk
        full_spec((H, H)), full_spec((1, H)),               # wv, bv
        full_spec((H, H)), full_spec((1, H)),               # wo, bo
        full_spec((1, H)), full_spec((1, H)),               # LN1 gamma, beta
        full_spec((H, inner_size)), full_spec((1, inner_size)),  # dense_1
        full_spec((inner_size, H)), full_spec((1, H)),      # dense_2
        full_spec((1, H)), full_spec((1, H)),               # LN2 gamma, beta
    ]
    inputs += list(params_c)

    kernel = _make_kernel(
        has_mask=has_mask, num_heads=num_heads, head_dim=head_dim,
        block_q=block_q, eps=eps, compute_dtype=compute_dtype,
        approx_gelu=approx_gelu, approx_recip=approx_softmax_reciprocal)

    compiler_kwargs = dict(dimension_semantics=("parallel", "arbitrary"))
    if vmem_limit_bytes is not None:
        compiler_kwargs["vmem_limit_bytes"] = vmem_limit_bytes

    return pl.pallas_call(
        kernel,
        out_shape=jax.ShapeDtypeStruct((B, S, H), x.dtype),
        grid=(B, n_q),
        in_specs=in_specs,
        out_specs=pl.BlockSpec((1, block_q, H), lambda b, q: (b, q, 0)),
        scratch_shapes=[pltpu.VMEM((S, H), compute_dtype),   # K cache (per batch)
                        pltpu.VMEM((S, H), compute_dtype)],  # V cache (per batch)
        compiler_params=pltpu.CompilerParams(**compiler_kwargs),
    )(*inputs)


# ---------------------------- reference (pure JAX) ---------------------------
def transformer_block_ref(x, mask, params, *, num_heads, eps=1e-12):
    (wq, bq, wk, bk, wv, bv, wo, bo, g1, be1, w1, b1, w2, b2, g2, be2) = params
    B, S, H = x.shape
    dh = H // num_heads

    def ln(y, g, b):
        u = jnp.mean(y, -1, keepdims=True)
        s = jnp.mean((y - u) ** 2, -1, keepdims=True)
        return g * ((y - u) / jnp.sqrt(s + eps)) + b

    q = (x @ wq + bq).reshape(B, S, num_heads, dh).transpose(0, 2, 1, 3)
    k = (x @ wk + bk).reshape(B, S, num_heads, dh).transpose(0, 2, 1, 3)
    v = (x @ wv + bv).reshape(B, S, num_heads, dh).transpose(0, 2, 1, 3)
    scores = jnp.einsum("bhqd,bhkd->bhqk", q, k) / math.sqrt(dh) + mask
    probs = jax.nn.softmax(scores, axis=-1)
    ctx = jnp.einsum("bhqk,bhkd->bhqd", probs, v).transpose(0, 2, 1, 3).reshape(B, S, H)
    h1 = ln(ctx @ wo + bo + x, g1, be1)
    inner = h1 @ w1 + b1
    inner = inner * 0.5 * (1.0 + jax.lax.erf(inner / jnp.sqrt(2.0)))
    return ln(inner @ w2 + b2 + h1, g2, be2)


def _make_params(key, H, dtype=jnp.float32):
    inner = 4 * H
    keys = jax.random.split(key, 6)

    def init(k, shape, scale=0.02):
        return (scale * jax.random.normal(k, shape)).astype(dtype)

    return (
        init(keys[0], (H, H)), jnp.zeros((1, H), dtype),          # q
        init(keys[1], (H, H)), jnp.zeros((1, H), dtype),          # k
        init(keys[2], (H, H)), jnp.zeros((1, H), dtype),          # v
        init(keys[3], (H, H)), jnp.zeros((1, H), dtype),          # out proj
        jnp.ones((1, H), dtype), jnp.zeros((1, H), dtype),        # LN1
        init(keys[4], (H, inner)), jnp.zeros((1, inner), dtype),  # dense_1
        init(keys[5], (inner, H)), jnp.zeros((1, H), dtype),      # dense_2
        jnp.ones((1, H), dtype), jnp.zeros((1, H), dtype),        # LN2
    )


def _causal_mask(B, S):
    causal = jnp.tril(jnp.ones((S, S), dtype=jnp.float32))
    return ((1.0 - causal) * -10000.0)[None, None, :, :].repeat(B, axis=0)


if __name__ == "__main__":
    # Full-f32 matmuls for the reference so the f32 kernel path can be compared
    # tightly (TPU default matmul precision would otherwise be bf16-ish).
    jax.config.update("jax_default_matmul_precision", "highest")

    key = jax.random.PRNGKey(0)
    k_small, k_med, k_x1, k_x2 = jax.random.split(key, 4)

    # ---------------- small-shape checks (explicit additive mask) -----------
    B, S, H, heads = 2, 16, 32, 2
    x = jax.random.normal(k_x1, (B, S, H), dtype=jnp.float32)
    mask = _causal_mask(B, S)
    params = _make_params(k_small, H)
    ref = transformer_block_ref(x, mask, params, num_heads=heads)

    # f32 compute path (exercises K/V caching across 2 query tiles per batch).
    out_f32 = transformer_block(x, mask, prepare_params(params, jnp.float32),
                                num_heads=heads, block_q=8,
                                compute_dtype=jnp.float32)
    out_f32 = jax.block_until_ready(out_f32)
    assert out_f32.shape == (B, S, H)
    assert jnp.allclose(out_f32, ref, atol=5e-3, rtol=5e-3), "f32 kernel mismatch"

    # bf16 MXU path (f32 accumulation), weights pre-cast once at load time.
    out_bf16 = transformer_block(x, mask, prepare_params(params, jnp.bfloat16),
                                 num_heads=heads, block_q=8,
                                 compute_dtype=jnp.bfloat16)
    out_bf16 = jax.block_until_ready(out_bf16)
    assert jnp.allclose(out_bf16, ref, atol=5e-2, rtol=5e-2), "bf16 kernel mismatch"

    # -------- lane-aligned shapes: head_dim=64, block_q=128, in-kernel causal
    Bm, Sm, Hm, heads_m = 2, 256, 256, 4
    xm = jax.random.normal(k_x2, (Bm, Sm, Hm), dtype=jnp.float32)
    params_m = _make_params(k_med, Hm)
    ref_m = transformer_block_ref(xm, _causal_mask(Bm, Sm), params_m,
                                  num_heads=heads_m)

    # Exact-f32 mode (exact softmax reciprocal) for a tight check of the tiling,
    # fused per-head output projection, and in-kernel causal mask.
    out_m32 = transformer_block(xm, None, prepare_params(params_m, jnp.float32),
                                num_heads=heads_m, block_q=128,
                                compute_dtype=jnp.float32, causal=True,
                                approx_softmax_reciprocal=False)
    out_m32 = jax.block_until_ready(out_m32)
    assert jnp.allclose(out_m32, ref_m, atol=5e-3, rtol=5e-3), \
        "f32 kernel mismatch at lane-aligned shapes"

    # bf16 path at the same shapes (loose tolerance: bf16 operand rounding).
    out_mbf = transformer_block(xm, None, prepare_params(params_m, jnp.bfloat16),
                                num_heads=heads_m, block_q=128,
                                compute_dtype=jnp.bfloat16, causal=True)
    out_mbf = jax.block_until_ready(out_mbf)
    assert not jnp.any(jnp.isnan(out_mbf)), "NaN in bf16 output"
    assert jnp.allclose(out_mbf, ref_m, atol=1e-1, rtol=1e-1), \
        "bf16 kernel mismatch at lane-aligned shapes"

    print("KERNEL_OK")
</pallas_src>

<mosaic_0001>
module attributes {stable_mosaic.version = 11 : i64} {
  func.func @kernel(%arg0: i32, %arg1: i32, %arg2: memref<1x16x32xf32, #tpu.memory_space<vmem>>, %arg3: memref<1x1x8x16xf32, #tpu.memory_space<vmem>>, %arg4: memref<32x32xf32, #tpu.memory_space<vmem>>, %arg5: memref<1x32xf32, #tpu.memory_space<vmem>>, %arg6: memref<32x32xf32, #tpu.memory_space<vmem>>, %arg7: memref<1x32xf32, #tpu.memory_space<vmem>>, %arg8: memref<32x32xf32, #tpu.memory_space<vmem>>, %arg9: memref<1x32xf32, #tpu.memory_space<vmem>>, %arg10: memref<32x32xf32, #tpu.memory_space<vmem>>, %arg11: memref<1x32xf32, #tpu.memory_space<vmem>>, %arg12: memref<1x32xf32, #tpu.memory_space<vmem>>, %arg13: memref<1x32xf32, #tpu.memory_space<vmem>>, %arg14: memref<32x128xf32, #tpu.memory_space<vmem>>, %arg15: memref<1x128xf32, #tpu.memory_space<vmem>>, %arg16: memref<128x32xf32, #tpu.memory_space<vmem>>, %arg17: memref<1x32xf32, #tpu.memory_space<vmem>>, %arg18: memref<1x32xf32, #tpu.memory_space<vmem>>, %arg19: memref<1x32xf32, #tpu.memory_space<vmem>>, %arg20: memref<1x8x32xf32, #tpu.memory_space<vmem>>, %arg21: memref<16x32xf32, #tpu.memory_space<vmem>>, %arg22: memref<16x32xf32, #tpu.memory_space<vmem>>) attributes {dimension_semantics = [#tpu.dimension_semantics<parallel>, #tpu.dimension_semantics<arbitrary>], iteration_bounds = array<i64: 2, 2>, scalar_prefetch = 0 : i64, scratch_operands = 2 : i64, tpu.core_type = #tpu.core_type<tc>, window_params = [{transform_indices = @transform_0, window_bounds = array<i64: 1, 16, 32>}, {transform_indices = @transform_1, window_bounds = array<i64: 1, 1, 8, 16>}, {pipeline_mode = #tpu.pipeline_mode<synchronous>, transform_indices = @transform_2, window_bounds = array<i64: 32, 32>}, {pipeline_mode = #tpu.pipeline_mode<synchronous>, transform_indices = @transform_3, window_bounds = array<i64: 1, 32>}, {pipeline_mode = #tpu.pipeline_mode<synchronous>, transform_indices = @transform_4, window_bounds = array<i64: 32, 32>}, {pipeline_mode = #tpu.pipeline_mode<synchronous>, transform_indices = @transform_5, window_bounds = array<i64: 1, 32>}, {pipeline_mode = #tpu.pipeline_mode<synchronous>, transform_indices = @transform_6, window_bounds = array<i64: 32, 32>}, {pipeline_mode = #tpu.pipeline_mode<synchronous>, transform_indices = @transform_7, window_bounds = array<i64: 1, 32>}, {pipeline_mode = #tpu.pipeline_mode<synchronous>, transform_indices = @transform_8, window_bounds = array<i64: 32, 32>}, {pipeline_mode = #tpu.pipeline_mode<synchronous>, transform_indices = @transform_9, window_bounds = array<i64: 1, 32>}, {pipeline_mode = #tpu.pipeline_mode<synchronous>, transform_indices = @transform_10, window_bounds = array<i64: 1, 32>}, {pipeline_mode = #tpu.pipeline_mode<synchronous>, transform_indices = @transform_11, window_bounds = array<i64: 1, 32>}, {pipeline_mode = #tpu.pipeline_mode<synchronous>, transform_indices = @transform_12, window_bounds = array<i64: 32, 128>}, {pipeline_mode = #tpu.pipeline_mode<synchronous>, transform_indices = @transform_13, window_bounds = array<i64: 1, 128>}, {pipeline_mode = #tpu.pipeline_mode<synchronous>, transform_indices = @transform_14, window_bounds = array<i64: 128, 32>}, {pipeline_mode = #tpu.pipeline_mode<synchronous>, transform_indices = @transform_15, window_bounds = array<i64: 1, 32>}, {pipeline_mode = #tpu.pipeline_mode<synchronous>, transform_indices = @transform_16, window_bounds = array<i64: 1, 32>}, {pipeline_mode = #tpu.pipeline_mode<synchronous>, transform_indices = @transform_17, window_bounds = array<i64: 1, 32>}, {transform_indices = @transform_18, window_bounds = array<i64: 1, 8, 32>}]} {
    %c0_i32 = arith.constant 0 : i32
    %0 = arith.cmpi eq, %arg1, %c0_i32 : i32
    %1 = arith.extui %0 : i1 to i32
    %c0_i32_0 = arith.constant 0 : i32
    %2 = arith.cmpi ne, %1, %c0_i32_0 : i32
    scf.if %2 {
      %c0_64 = arith.constant 0 : index
      %c0_65 = arith.constant 0 : index
      %c0_66 = arith.constant 0 : index
      %133 = vector.load %arg2[%c0_64, %c0_65, %c0_66] : memref<1x16x32xf32, #tpu.memory_space<vmem>>, vector<1x16x32xf32>
      %134 = vector.shape_cast %133 : vector<1x16x32xf32> to vector<16x32xf32>
      %c0_67 = arith.constant 0 : index
      %c0_68 = arith.constant 0 : index
      %135 = vector.load %arg6[%c0_67, %c0_68] : memref<32x32xf32, #tpu.memory_space<vmem>>, vector<32x32xf32>
      %cst_69 = arith.constant dense<0.000000e+00> : vector<16x32xf32>
      %136 = tpu.matmul %134, %135, %cst_69 {dimension_numbers = #tpu.dot_dimension_numbers<[1], [0], [0], [1], [0, 0, 1, 1], [], []>, precision = #tpu.contract_precision<fp32>} : vector<16x32xf32>, vector<32x32xf32>, vector<16x32xf32> -> vector<16x32xf32>
      %c0_70 = arith.constant 0 : index
      %c0_71 = arith.constant 0 : index
      %137 = vector.load %arg7[%c0_70, %c0_71] : memref<1x32xf32, #tpu.memory_space<vmem>>, vector<1x32xf32>
      %138 = vector.broadcast %137 : vector<1x32xf32> to vector<16x32xf32>
      %139 = arith.addf %136, %138 : vector<16x32xf32>
      %c0_72 = arith.constant 0 : index
      %c0_73 = arith.constant 0 : index
      %140 = vector.load %arg8[%c0_72, %c0_73] : memref<32x32xf32, #tpu.memory_space<vmem>>, vector<32x32xf32>
      %cst_74 = arith.constant dense<0.000000e+00> : vector<16x32xf32>
      %141 = tpu.matmul %134, %140, %cst_74 {dimension_numbers = #tpu.dot_dimension_numbers<[1], [0], [0], [1], [0, 0, 1, 1], [], []>, precision = #tpu.contract_precision<fp32>} : vector<16x32xf32>, vector<32x32xf32>, vector<16x32xf32> -> vector<16x32xf32>
      %c0_75 = arith.constant 0 : index
      %c0_76 = arith.constant 0 : index
      %142 = vector.load %arg9[%c0_75, %c0_76] : memref<1x32xf32, #tpu.memory_space<vmem>>, vector<1x32xf32>
      %143 = vector.broadcast %142 : vector<1x32xf32> to vector<16x32xf32>
      %144 = arith.addf %141, %143 : vector<16x32xf32>
      %c0_77 = arith.constant 0 : index
      %c0_78 = arith.constant 0 : index
      %145 = vector.load %arg21[%c0_77, %c0_78] : memref<16x32xf32, #tpu.memory_space<vmem>>, vector<16x32xf32>
      tpu.vector_store %arg21[%c0_77, %c0_78], %139 {strides = array<i32>} : memref<16x32xf32, #tpu.memory_space<vmem>>, vector<16x32xf32>,
      %c0_79 = arith.constant 0 : index
      %c0_80 = arith.constant 0 : index
      %146 = vector.load %arg22[%c0_79, %c0_80] : memref<16x32xf32, #tpu.memory_space<vmem>>, vector<16x32xf32>
      tpu.vector_store %arg22[%c0_79, %c0_80], %144 {strides = array<i32>} : memref<16x32xf32, #tpu.memory_space<vmem>>, vector<16x32xf32>,
    } else {
    }
    %c8_i32 = arith.constant 8 : i32
    %3 = arith.muli %arg1, %c8_i32 : i32
    %4 = tpu.assume_multiple %3, 8 : i32
    %c0 = arith.constant 0 : index
    %5 = arith.index_cast %4 : i32 to index
    %c0_1 = arith.constant 0 : index
    %6 = vector.load %arg2[%c0, %5, %c0_1] : memref<1x16x32xf32, #tpu.memory_space<vmem>>, vector<1x8x32xf32>
    %7 = vector.shape_cast %6 : vector<1x8x32xf32> to vector<8x32xf32>
    %c0_2 = arith.constant 0 : index
    %c0_3 = arith.constant 0 : index
    %c0_4 = arith.constant 0 : index
    %c0_5 = arith.constant 0 : index
    %8 = vector.load %arg3[%c0_2, %c0_3, %c0_4, %c0_5] : memref<1x1x8x16xf32, #tpu.memory_space<vmem>>, vector<1x1x8x16xf32>
    %9 = vector.shape_cast %8 : vector<1x1x8x16xf32> to vector<8x16xf32>
    %c0_6 = arith.constant 0 : index
    %c0_7 = arith.constant 0 : index
    %10 = vector.load %arg5[%c0_6, %c0_7] : memref<1x32xf32, #tpu.memory_space<vmem>>, vector<1x32xf32>
    %c0_8 = arith.constant 0 : index
    %c0_9 = arith.constant 0 : index
    %11 = vector.load %arg11[%c0_8, %c0_9] : memref<1x32xf32, #tpu.memory_space<vmem>>, vector<1x32xf32>
    %c0_10 = arith.constant 0 : index
    %c0_11 = arith.constant 0 : index
    %12 = vector.load %arg15[%c0_10, %c0_11] : memref<1x128xf32, #tpu.memory_space<vmem>>, vector<1x128xf32>
    %c0_12 = arith.constant 0 : index
    %c0_13 = arith.constant 0 : index
    %13 = vector.load %arg17[%c0_12, %c0_13] : memref<1x32xf32, #tpu.memory_space<vmem>>, vector<1x32xf32>
    %c0_14 = arith.constant 0 : index
    %c0_15 = arith.constant 0 : index
    %14 = vector.load %arg12[%c0_14, %c0_15] : memref<1x32xf32, #tpu.memory_space<vmem>>, vector<1x32xf32>
    %c0_16 = arith.constant 0 : index
    %c0_17 = arith.constant 0 : index
    %15 = vector.load %arg13[%c0_16, %c0_17] : memref<1x32xf32, #tpu.memory_space<vmem>>, vector<1x32xf32>
    %c0_18 = arith.constant 0 : index
    %c0_19 = arith.constant 0 : index
    %16 = vector.load %arg18[%c0_18, %c0_19] : memref<1x32xf32, #tpu.memory_space<vmem>>, vector<1x32xf32>
    %c0_20 = arith.constant 0 : index
    %c0_21 = arith.constant 0 : index
    %17 = vector.load %arg19[%c0_20, %c0_21] : memref<1x32xf32, #tpu.memory_space<vmem>>, vector<1x32xf32>
    %c0_22 = arith.constant 0 : index
    %c0_23 = arith.constant 0 : index
    %18 = vector.load %arg10[%c0_22, %c0_23] : memref<32x32xf32, #tpu.memory_space<vmem>>, vector<32x32xf32>
    %c0_24 = arith.constant 0 : index
    %c0_25 = arith.constant 0 : index
    %19 = vector.load %arg21[%c0_24, %c0_25] : memref<16x32xf32, #tpu.memory_space<vmem>>, vector<16x32xf32>
    %c0_26 = arith.constant 0 : index
    %c0_27 = arith.constant 0 : index
    %20 = vector.load %arg22[%c0_26, %c0_27] : memref<16x32xf32, #tpu.memory_space<vmem>>, vector<16x32xf32>
    %c0_28 = arith.constant 0 : index
    %c0_29 = arith.constant 0 : index
    %21 = vector.load %arg4[%c0_28, %c0_29] : memref<32x32xf32, #tpu.memory_space<vmem>>, vector<32x32xf32>
    %cst = arith.constant dense<0.000000e+00> : vector<8x32xf32>
    %22 = tpu.matmul %7, %21, %cst {dimension_numbers = #tpu.dot_dimension_numbers<[1], [0], [0], [1], [0, 0, 1, 1], [], []>, precision = #tpu.contract_precision<fp32>} : vector<8x32xf32>, vector<32x32xf32>, vector<8x32xf32> -> vector<8x32xf32>
    %23 = vector.broadcast %10 : vector<1x32xf32> to vector<8x32xf32>
    %24 = arith.addf %22, %23 : vector<8x32xf32>
    %25 = vector.extract_strided_slice %24 {offsets = [0, 0], sizes = [8, 16], strides = [1, 1]} : vector<8x32xf32> to vector<8x16xf32>
    %26 = vector.extract_strided_slice %19 {offsets = [0, 0], sizes = [16, 16], strides = [1, 1]} : vector<16x32xf32> to vector<16x16xf32>
    %27 = vector.extract_strided_slice %20 {offsets = [0, 0], sizes = [16, 16], strides = [1, 1]} : vector<16x32xf32> to vector<16x16xf32>
    %cst_30 = arith.constant dense<0.000000e+00> : vector<8x16xf32>
    %28 = tpu.matmul %25, %26, %cst_30 {dimension_numbers = #tpu.dot_dimension_numbers<[1], [1], [0], [0], [0, 0, 1, 0], [], []>, precision = #tpu.contract_precision<fp32>} : vector<8x16xf32>, vector<16x16xf32>, vector<8x16xf32> -> vector<8x16xf32>
    %cst_31 = arith.constant 2.500000e-01 : f32
    %29 = vector.broadcast %cst_31 : f32 to vector<8x16xf32>
    %30 = arith.mulf %28, %29 : vector<8x16xf32>
    %31 = arith.addf %30, %9 : vector<8x16xf32>
    %cst_32 = arith.constant dense<0xFF800000> : vector<8xf32>
    %32 = vector.multi_reduction <maximumf>, %31, %cst_32 [1] : vector<8x16xf32> to vector<8xf32>
    %33 = vector.shape_cast %32 : vector<8xf32> to vector<8x1xf32>
    %34 = vector.broadcast %33 : vector<8x1xf32> to vector<8x16xf32>
    %35 = arith.subf %31, %34 : vector<8x16xf32>
    %36 = math.exp %35 : vector<8x16xf32>
    %cst_33 = arith.constant dense<0.000000e+00> : vector<8xf32>
    %37 = vector.multi_reduction <add>, %36, %cst_33 [1] : vector<8x16xf32> to vector<8xf32>
    %38 = vector.shape_cast %37 : vector<8xf32> to vector<8x1xf32>
    %39 = tpu.reciprocal %38 {approx = true} : vector<8x1xf32> -> vector<8x1xf32>
    %40 = vector.broadcast %39 : vector<8x1xf32> to vector<8x16xf32>
    %41 = arith.mulf %36, %40 : vector<8x16xf32>
    %cst_34 = arith.constant dense<0.000000e+00> : vector<8x16xf32>
    %42 = tpu.matmul %41, %27, %cst_34 {dimension_numbers = #tpu.dot_dimension_numbers<[1], [0], [0], [1], [0, 0, 1, 1], [], []>, precision = #tpu.contract_precision<fp32>} : vector<8x16xf32>, vector<16x16xf32>, vector<8x16xf32> -> vector<8x16xf32>
    %43 = vector.extract_strided_slice %18 {offsets = [0, 0], sizes = [16, 32], strides = [1, 1]} : vector<32x32xf32> to vector<16x32xf32>
    %cst_35 = arith.constant dense<0.000000e+00> : vector<8x32xf32>
    %44 = tpu.matmul %42, %43, %cst_35 {dimension_numbers = #tpu.dot_dimension_numbers<[1], [0], [0], [1], [0, 0, 1, 1], [], []>, precision = #tpu.contract_precision<fp32>} : vector<8x16xf32>, vector<16x32xf32>, vector<8x32xf32> -> vector<8x32xf32>
    %45 = vector.extract_strided_slice %24 {offsets = [0, 16], sizes = [8, 16], strides = [1, 1]} : vector<8x32xf32> to vector<8x16xf32>
    %46 = vector.extract_strided_slice %19 {offsets = [0, 16], sizes = [16, 16], strides = [1, 1]} : vector<16x32xf32> to vector<16x16xf32>
    %47 = vector.extract_strided_slice %20 {offsets = [0, 16], sizes = [16, 16], strides = [1, 1]} : vector<16x32xf32> to vector<16x16xf32>
    %cst_36 = arith.constant dense<0.000000e+00> : vector<8x16xf32>
    %48 = tpu.matmul %45, %46, %cst_36 {dimension_numbers = #tpu.dot_dimension_numbers<[1], [1], [0], [0], [0, 0, 1, 0], [], []>, precision = #tpu.contract_precision<fp32>} : vector<8x16xf32>, vector<16x16xf32>, vector<8x16xf32> -> vector<8x16xf32>
    %cst_37 = arith.constant 2.500000e-01 : f32
    %49 = vector.broadcast %cst_37 : f32 to vector<8x16xf32>
    %50 = arith.mulf %48, %49 : vector<8x16xf32>
    %51 = arith.addf %50, %9 : vector<8x16xf32>
    %cst_38 = arith.constant dense<0xFF800000> : vector<8xf32>
    %52 = vector.multi_reduction <maximumf>, %51, %cst_38 [1] : vector<8x16xf32> to vector<8xf32>
    %53 = vector.shape_cast %52 : vector<8xf32> to vector<8x1xf32>
    %54 = vector.broadcast %53 : vector<8x1xf32> to vector<8x16xf32>
    %55 = arith.subf %51, %54 : vector<8x16xf32>
    %56 = math.exp %55 : vector<8x16xf32>
    %cst_39 = arith.constant dense<0.000000e+00> : vector<8xf32>
    %57 = vector.multi_reduction <add>, %56, %cst_39 [1] : vector<8x16xf32> to vector<8xf32>
    %58 = vector.shape_cast %57 : vector<8xf32> to vector<8x1xf32>
    %59 = tpu.reciprocal %58 {approx = true} : vector<8x1xf32> -> vector<8x1xf32>
    %60 = vector.broadcast %59 : vector<8x1xf32> to vector<8x16xf32>
    %61 = arith.mulf %56, %60 : vector<8x16xf32>
    %cst_40 = arith.constant dense<0.000000e+00> : vector<8x16xf32>
    %62 = tpu.matmul %61, %47, %cst_40 {dimension_numbers = #tpu.dot_dimension_numbers<[1], [0], [0], [1], [0, 0, 1, 1], [], []>, precision = #tpu.contract_precision<fp32>} : vector<8x16xf32>, vector<16x16xf32>, vector<8x16xf32> -> vector<8x16xf32>
    %63 = vector.extract_strided_slice %18 {offsets = [16, 0], sizes = [16, 32], strides = [1, 1]} : vector<32x32xf32> to vector<16x32xf32>
    %cst_41 = arith.constant dense<0.000000e+00> : vector<8x32xf32>
    %64 = tpu.matmul %62, %63, %cst_41 {dimension_numbers = #tpu.dot_dimension_numbers<[1], [0], [0], [1], [0, 0, 1, 1], [], []>, precision = #tpu.contract_precision<fp32>} : vector<8x16xf32>, vector<16x32xf32>, vector<8x32xf32> -> vector<8x32xf32>
    %65 = arith.addf %44, %64 : vector<8x32xf32>
    %66 = vector.broadcast %11 : vector<1x32xf32> to vector<8x32xf32>
    %67 = arith.addf %65, %66 : vector<8x32xf32>
    %68 = arith.addf %67, %7 : vector<8x32xf32>
    %cst_42 = arith.constant dense<0.000000e+00> : vector<8xf32>
    %69 = vector.multi_reduction <add>, %68, %cst_42 [1] : vector<8x32xf32> to vector<8xf32>
    %70 = vector.shape_cast %69 : vector<8xf32> to vector<8x1xf32>
    %cst_43 = arith.constant 3.200000e+01 : f32
    %71 = vector.broadcast %cst_43 : f32 to vector<8x1xf32>
    %72 = arith.divf %70, %71 : vector<8x1xf32>
    %73 = vector.broadcast %72 : vector<8x1xf32> to vector<8x32xf32>
    %74 = arith.subf %68, %73 : vector<8x32xf32>
    %75 = arith.mulf %74, %74 : vector<8x32xf32>
    %cst_44 = arith.constant dense<0.000000e+00> : vector<8xf32>
    %76 = vector.multi_reduction <add>, %75, %cst_44 [1] : vector<8x32xf32> to vector<8xf32>
    %77 = vector.shape_cast %76 : vector<8xf32> to vector<8x1xf32>
    %cst_45 = arith.constant 3.200000e+01 : f32
    %78 = vector.broadcast %cst_45 : f32 to vector<8x1xf32>
    %79 = arith.divf %77, %78 : vector<8x1xf32>
    %80 = vector.broadcast %72 : vector<8x1xf32> to vector<8x32xf32>
    %81 = arith.subf %68, %80 : vector<8x32xf32>
    %cst_46 = arith.constant 9.99999996E-13 : f32
    %82 = vector.broadcast %cst_46 : f32 to vector<8x1xf32>
    %83 = arith.addf %79, %82 : vector<8x1xf32>
    %84 = math.rsqrt %83 : vector<8x1xf32>
    %85 = vector.broadcast %84 : vector<8x1xf32> to vector<8x32xf32>
    %86 = arith.mulf %81, %85 : vector<8x32xf32>
    %87 = vector.broadcast %14 : vector<1x32xf32> to vector<8x32xf32>
    %88 = arith.mulf %87, %86 : vector<8x32xf32>
    %89 = vector.broadcast %15 : vector<1x32xf32> to vector<8x32xf32>
    %90 = arith.addf %88, %89 : vector<8x32xf32>
    %c0_47 = arith.constant 0 : index
    %c0_48 = arith.constant 0 : index
    %91 = vector.load %arg14[%c0_47, %c0_48] : memref<32x128xf32, #tpu.memory_space<vmem>>, vector<32x128xf32>
    %cst_49 = arith.constant dense<0.000000e+00> : vector<8x128xf32>
    %92 = tpu.matmul %90, %91, %cst_49 {dimension_numbers = #tpu.dot_dimension_numbers<[1], [0], [0], [1], [0, 0, 1, 1], [], []>, precision = #tpu.contract_precision<fp32>} : vector<8x32xf32>, vector<32x128xf32>, vector<8x128xf32> -> vector<8x128xf32>
    %93 = vector.broadcast %12 : vector<1x128xf32> to vector<8x128xf32>
    %94 = arith.addf %92, %93 : vector<8x128xf32>
    %cst_50 = arith.constant 5.000000e-01 : f32
    %95 = vector.broadcast %cst_50 : f32 to vector<8x128xf32>
    %96 = arith.mulf %94, %95 : vector<8x128xf32>
    %cst_51 = arith.constant 0.707106769 : f32
    %97 = vector.broadcast %cst_51 : f32 to vector<8x128xf32>
    %98 = arith.mulf %94, %97 : vector<8x128xf32>
    %99 = math.erf %98 : vector<8x128xf32>
    %cst_52 = arith.constant 1.000000e+00 : f32
    %100 = vector.broadcast %cst_52 : f32 to vector<8x128xf32>
    %101 = arith.addf %100, %99 : vector<8x128xf32>
    %102 = arith.mulf %96, %101 : vector<8x128xf32>
    %c0_53 = arith.constant 0 : index
    %c0_54 = arith.constant 0 : index
    %103 = vector.load %arg16[%c0_53, %c0_54] : memref<128x32xf32, #tpu.memory_space<vmem>>, vector<128x32xf32>
    %cst_55 = arith.constant dense<0.000000e+00> : vector<8x32xf32>
    %104 = tpu.matmul %102, %103, %cst_55 {dimension_numbers = #tpu.dot_dimension_numbers<[1], [0], [0], [1], [0, 0, 1, 1], [], []>, precision = #tpu.contract_precision<fp32>} : vector<8x128xf32>, vector<128x32xf32>, vector<8x32xf32> -> vector<8x32xf32>
    %105 = vector.broadcast %13 : vector<1x32xf32> to vector<8x32xf32>
    %106 = arith.addf %104, %105 : vector<8x32xf32>
    %107 = arith.addf %106, %90 : vector<8x32xf32>
    %cst_56 = arith.constant dense<0.000000e+00> : vector<8xf32>
    %108 = vector.multi_reduction <add>, %107, %cst_56 [1] : vector<8x32xf32> to vector<8xf32>
    %109 = vector.shape_cast %108 : vector<8xf32> to vector<8x1xf32>
    %cst_57 = arith.constant 3.200000e+01 : f32
    %110 = vector.broadcast %cst_57 : f32 to vector<8x1xf32>
    %111 = arith.divf %109, %110 : vector<8x1xf32>
    %112 = vector.broadcast %111 : vector<8x1xf32> to vector<8x32xf32>
    %113 = arith.subf %107, %112 : vector<8x32xf32>
    %114 = arith.mulf %113, %113 : vector<8x32xf32>
    %cst_58 = arith.constant dense<0.000000e+00> : vector<8xf32>
    %115 = vector.multi_reduction <add>, %114, %cst_58 [1] : vector<8x32xf32> to vector<8xf32>
    %116 = vector.shape_cast %115 : vector<8xf32> to vector<8x1xf32>
    %cst_59 = arith.constant 3.200000e+01 : f32
    %117 = vector.broadcast %cst_59 : f32 to vector<8x1xf32>
    %118 = arith.divf %116, %117 : vector<8x1xf32>
    %119 = vector.broadcast %111 : vector<8x1xf32> to vector<8x32xf32>
    %120 = arith.subf %107, %119 : vector<8x32xf32>
    %cst_60 = arith.constant 9.99999996E-13 : f32
    %121 = vector.broadcast %cst_60 : f32 to vector<8x1xf32>
    %122 = arith.addf %118, %121 : vector<8x1xf32>
    %123 = math.rsqrt %122 : vector<8x1xf32>
    %124 = vector.broadcast %123 : vector<8x1xf32> to vector<8x32xf32>
    %125 = arith.mulf %120, %124 : vector<8x32xf32>
    %126 = vector.broadcast %16 : vector<1x32xf32> to vector<8x32xf32>
    %127 = arith.mulf %126, %125 : vector<8x32xf32>
    %128 = vector.broadcast %17 : vector<1x32xf32> to vector<8x32xf32>
    %129 = arith.addf %127, %128 : vector<8x32xf32>
    %c0_61 = arith.constant 0 : index
    %c0_62 = arith.constant 0 : index
    %c0_63 = arith.constant 0 : index
    %130 = vector.load %arg20[%c0_61, %c0_62, %c0_63] : memref<1x8x32xf32, #tpu.memory_space<vmem>>, vector<1x8x32xf32>
    %131 = vector.shape_cast %130 : vector<1x8x32xf32> to vector<8x32xf32>
    %132 = vector.shape_cast %129 : vector<8x32xf32> to vector<1x8x32xf32>
    tpu.vector_store %arg20[%c0_61, %c0_62, %c0_63], %132 {strides = array<i32>} : memref<1x8x32xf32, #tpu.memory_space<vmem>>, vector<1x8x32xf32>,
    return
  }
  func.func @transform_0(%arg0: i32, %arg1: i32) -> (i32, i32, i32) {
    %c0_i32 = arith.constant 0 : i32
    %c0_i32_0 = arith.constant 0 : i32
    %c0_i32_1 = arith.constant 0 : i32
    return %arg0, %c0_i32, %c0_i32_0 : i32, i32, i32
  }
  func.func @transform_1(%arg0: i32, %arg1: i32) -> (i32, i32, i32, i32) {
    %c0_i32 = arith.constant 0 : i32
    %c0_i32_0 = arith.constant 0 : i32
    %c0_i32_1 = arith.constant 0 : i32
    return %arg0, %c0_i32, %arg1, %c0_i32_0 : i32, i32, i32, i32
  }
  func.func @transform_2(%arg0: i32, %arg1: i32) -> (i32, i32) {
    %c0_i32 = arith.constant 0 : i32
    %c0_i32_0 = arith.constant 0 : i32
    %c0_i32_1 = arith.constant 0 : i32
    return %c0_i32, %c0_i32_0 : i32, i32
  }
  func.func @transform_3(%arg0: i32, %arg1: i32) -> (i32, i32) {
    %c0_i32 = arith.constant 0 : i32
    %c0_i32_0 = arith.constant 0 : i32
    %c0_i32_1 = arith.constant 0 : i32
    return %c0_i32, %c0_i32_0 : i32, i32
  }
  func.func @transform_4(%arg0: i32, %arg1: i32) -> (i32, i32) {
    %c0_i32 = arith.constant 0 : i32
    %c0_i32_0 = arith.constant 0 : i32
    %c0_i32_1 = arith.constant 0 : i32
    return %c0_i32, %c0_i32_0 : i32, i32
  }
  func.func @transform_5(%arg0: i32, %arg1: i32) -> (i32, i32) {
    %c0_i32 = arith.constant 0 : i32
    %c0_i32_0 = arith.constant 0 : i32
    %c0_i32_1 = arith.constant 0 : i32
    return %c0_i32, %c0_i32_0 : i32, i32
  }
  func.func @transform_6(%arg0: i32, %arg1: i32) -> (i32, i32) {
    %c0_i32 = arith.constant 0 : i32
    %c0_i32_0 = arith.constant 0 : i32
    %c0_i32_1 = arith.constant 0 : i32
    return %c0_i32, %c0_i32_0 : i32, i32
  }
  func.func @transform_7(%arg0: i32, %arg1: i32) -> (i32, i32) {
    %c0_i32 = arith.constant 0 : i32
    %c0_i32_0 = arith.constant 0 : i32
    %c0_i32_1 = arith.constant 0 : i32
    return %c0_i32, %c0_i32_0 : i32, i32
  }
  func.func @transform_8(%arg0: i32, %arg1: i32) -> (i32, i32) {
    %c0_i32 = arith.constant 0 : i32
    %c0_i32_0 = arith.constant 0 : i32
    %c0_i32_1 = arith.constant 0 : i32
    return %c0_i32, %c0_i32_0 : i32, i32
  }
  func.func @transform_9(%arg0: i32, %arg1: i32) -> (i32, i32) {
    %c0_i32 = arith.constant 0 : i32
    %c0_i32_0 = arith.constant 0 : i32
    %c0_i32_1 = arith.constant 0 : i32
    return %c0_i32, %c0_i32_0 : i32, i32
  }
  func.func @transform_10(%arg0: i32, %arg1: i32) -> (i32, i32) {
    %c0_i32 = arith.constant 0 : i32
    %c0_i32_0 = arith.constant 0 : i32
    %c0_i32_1 = arith.constant 0 : i32
    return %c0_i32, %c0_i32_0 : i32, i32
  }
  func.func @transform_11(%arg0: i32, %arg1: i32) -> (i32, i32) {
    %c0_i32 = arith.constant 0 : i32
    %c0_i32_0 = arith.constant 0 : i32
    %c0_i32_1 = arith.constant 0 : i32
    return %c0_i32, %c0_i32_0 : i32, i32
  }
  func.func @transform_12(%arg0: i32, %arg1: i32) -> (i32, i32) {
    %c0_i32 = arith.constant 0 : i32
    %c0_i32_0 = arith.constant 0 : i32
    %c0_i32_1 = arith.constant 0 : i32
    return %c0_i32, %c0_i32_0 : i32, i32
  }
  func.func @transform_13(%arg0: i32, %arg1: i32) -> (i32, i32) {
    %c0_i32 = arith.constant 0 : i32
    %c0_i32_0 = arith.constant 0 : i32
    %c0_i32_1 = arith.constant 0 : i32
    return %c0_i32, %c0_i32_0 : i32, i32
  }
  func.func @transform_14(%arg0: i32, %arg1: i32) -> (i32, i32) {
    %c0_i32 = arith.constant 0 : i32
    %c0_i32_0 = arith.constant 0 : i32
    %c0_i32_1 = arith.constant 0 : i32
    return %c0_i32, %c0_i32_0 : i32, i32
  }
  func.func @transform_15(%arg0: i32, %arg1: i32) -> (i32, i32) {
    %c0_i32 = arith.constant 0 : i32
    %c0_i32_0 = arith.constant 0 : i32
    %c0_i32_1 = arith.constant 0 : i32
    return %c0_i32, %c0_i32_0 : i32, i32
  }
  func.func @transform_16(%arg0: i32, %arg1: i32) -> (i32, i32) {
    %c0_i32 = arith.constant 0 : i32
    %c0_i32_0 = arith.constant 0 : i32
    %c0_i32_1 = arith.constant 0 : i32
    return %c0_i32, %c0_i32_0 : i32, i32
  }
  func.func @transform_17(%arg0: i32, %arg1: i32) -> (i32, i32) {
    %c0_i32 = arith.constant 0 : i32
    %c0_i32_0 = arith.constant 0 : i32
    %c0_i32_1 = arith.constant 0 : i32
    return %c0_i32, %c0_i32_0 : i32, i32
  }
  func.func @transform_18(%arg0: i32, %arg1: i32) -> (i32, i32, i32) {
    %c0_i32 = arith.constant 0 : i32
    %c0_i32_0 = arith.constant 0 : i32
    return %arg0, %arg1, %c0_i32 : i32, i32, i32
  }
}

</mosaic_0001>

<bundles_post_ra>
// kernel: tpu_custom_call.1
= control target key start
LH: loop header
LB: loop body
LE: loop exit
PB: predicated region body
PF: predicated region fallthrough
CT: control target
= control target key end

     0   :  { %s9386_s0 = inlined_call_operand.vmem [shape: f32[2,16,32], index: 0, kind: input, shape index: {}]   ;;  %s9387_s1 = inlined_call_operand.vmem [shape: f32[2,1,16,16], index: 1, kind: input, shape index: {}]   ;;  %s9388_s2 = inlined_call_operand.vmem [shape: f32[32,32], index: 2, kind: input, shape index: {}]   ;;  %s9389_s3 = inlined_call_operand.vmem [shape: f32[1,32], index: 3, kind: input, shape index: {}]   ;;  %s9390_s4 = inlined_call_operand.vmem [shape: f32[32,32], index: 4, kind: input, shape index: {}]   ;;  %s9391_s5 = inlined_call_operand.vmem [shape: f32[1,32], index: 5, kind: input, shape index: {}]   ;;  %s9392_s6 = inlined_call_operand.vmem [shape: f32[32,32], index: 6, kind: input, shape index: {}]   ;;  %s9393_s7 = inlined_call_operand.vmem [shape: f32[1,32], index: 7, kind: input, shape index: {}]   ;;  %s9394_s8 = inlined_call_operand.hbm [shape: f32[32,32], index: 8, kind: input, shape index: {}]   ;;  %s9395_s9 = inlined_call_operand.vmem [shape: f32[1,32], index: 9, kind: input, shape index: {}]   ;;  %s9396_s10 = inlined_call_operand.vmem [shape: f32[1,32], index: 10, kind: input, shape index: {}]   ;;  %s9397_s11 = inlined_call_operand.vmem [shape: f32[1,32], index: 11, kind: input, shape index: {}]   ;;  %s9398_s12 = inlined_call_operand.hbm [shape: f32[32,128], index: 12, kind: input, shape index: {}]   ;;  %s9399_s13 = inlined_call_operand.vmem [shape: f32[1,128], index: 13, kind: input, shape index: {}]   ;;  %s9400_s14 = inlined_call_operand.vmem [shape: f32[128,32], index: 14, kind: input, shape index: {}]   ;;  %s9401_s15 = inlined_call_operand.vmem [shape: f32[1,32], index: 15, kind: input, shape index: {}]   ;;  %s9402_s16 = inlined_call_operand.vmem [shape: f32[1,32], index: 16, kind: input, shape index: {}]   ;;  %s9403_s17 = inlined_call_operand.vmem [shape: f32[1,32], index: 17, kind: input, shape index: {}]   ;;  %s9404_s18 = inlined_call_operand.hbm [shape: f32[2,16,32], index: 18, kind: output, shape index: {}]  }
   0x1   :  { %9423 = sst [smem:[#allocation23_spill]] %s9386_s0 }
   0x2   :  { %9424 = sst [smem:[#allocation24_spill]] %s9387_s1 }
   0x3   :  { %9425 = sst [smem:[#allocation25_spill]] %s9388_s2 }
   0x4   :  { %9426 = sst [smem:[#allocation26_spill]] %s9394_s8 }
   0x5   :  { %9427 = sst [smem:[#allocation27_spill]] %s9399_s13 }
   0x6   :  { %9428 = sst [smem:[#allocation28_spill]] %s9401_s15 }
   0x7   :  { %9429 = sst [smem:[#allocation29_spill]] %s9402_s16 }
   0x8   :  { %9430 = sst [smem:[#allocation30_spill]] %s9403_s17 }
   0x9   :  { %9431 = sst [smem:[#allocation31_spill]] %s9404_s18 }
   0xa   :  { %23 = vsyncpa [#allocation5], 0 }
   0xb   :  { %24 = vsyncpa [#allocation8], 0 }
   0xc   :  { %25 = vsyncpa [#allocation6], 0 }
   0xd   :  { %27 = vsyncpa [#allocation6 + $0x1], 0  ;;  %s8427_s27 = smov 0   ;;  %s8429_s28 = smov 0  }
   0xe   :  { %s8431_s29 = smov 0   ;;  %s8433_s30 = smov 0  }
   0xf   :  { %s8435_s0 = smov 0   ;;  %s8437_s19 = smov 0  }
  0x10   :  { %s8439_s1 = smov 0   ;;  %s8441_s20 = smov 0  }
  0x11 LB: > { %9432 = sst [smem:[#allocation13_spill]] %s8293_s27  ;;  %s6446_s21 = sadd.s32 4294967295, %s8321_s20   ;;  %s8321_s20 = sphi %s8441_s20, %s33_s20   ;;  %s8317_s1 = sphi %s8439_s1, %s9474_s1   ;;  %s8313_s19 = sphi %s8437_s19, %s9470_s19   ;;  %s8309_s0 = sphi %s8435_s0, %s9469_s0   ;;  %s8305_s30 = sphi %s8433_s30, %s9468_s30   ;;  %s8301_s29 = sphi %s8431_s29, %s9467_s29   ;;  %s8297_s28 = sphi %s8429_s28, %s9473_s28   ;;  %s8293_s27 = sphi %s8427_s27, %s9472_s27  }
  0x12   : > { %9433 = sst [smem:[#allocation14_spill]] %s8301_s29  ;;  %s6447_s22 = sadd.s32 4294967294, %s8321_s20  }
  0x13   : > { %9434 = sst [smem:[#allocation15_spill]] %s8313_s19  ;;  %s42_s2 = sadd.s32 1, %s8313_s19 }
  0x14   : > { %9435 = sst [smem:[#allocation16_spill]] %s8317_s1  ;;  %s45_s23 = sadd.s32 1, %s8317_s1 }
  0x15   : > { %9436 = sst [smem:[#allocation17_spill]] %s8321_s20  ;;  %p43_p0 = scmp.ge.s32.totalorder %s42_s2, 2 }
  0x16   : > { %s444_s24 = sadd.s32 1, %s8301_s29  ;;  %p454_p1 = scmp.ne.s32.totalorder %s8301_s29, %s8297_s28 }
  0x17   : > { %p455_p2 = scmp.eq.s32.totalorder %s6446_s21, 3  ;;  %s9476_s2 = smov (%p43_p0, %s42_s2), 0 }
  0x18   : > { %9437 = sst [smem:[#allocation18_spill]] %s9476_s2  ;;  %s9478_s23 = smov (!%p43_p0, %s45_s23), %s8317_s1 }
  0x19   : > { %s440_s25 = ssub.s32 %s8313_s19, %s9476_s2  ;;  %p8479_p3 = por %p455_p2, %p454_p1 }
  0x1a   : > { %p47_p4 = scmp.ge.s32.totalorder %s9478_s23, 2  ;;  %p460_p5 = scmp.ne.s32.totalorder %s8297_s28, %s8293_s27 }
  0x1b   : > { %s9438_s26 = scalar_select %p8479_p3, 1, 0 }
  0x1c   : > { %p461_p6 = scmp.eq.s32.totalorder %s6447_s22, 3  ;;  %p6448_p7 = scmp.ge.s32.totalorder %s8321_s20, 1 }
  0x1d   : > { %9439 = sst [smem:[#allocation19_spill]] %s9438_s26  ;;  %s9480_s23 = smov (%p47_p4, %s9478_s23), 0 }
  0x1e   : > { %9440 = sst [smem:[#allocation20_spill]] %s9480_s23  ;;  %p8488_p8 = por %p461_p6, %p460_p5 }
  0x1f   : > { %p468_p9 = scmp.lt.s32.totalorder %s8321_s20, 5  ;;  %s439_s17 = ssub.s32 %s8317_s1, %s9480_s23 }
  0x20   : > { %s9441_s18 = scalar_select %p8488_p8, 1, 0 }
  0x21   : > { %s441_s16 = sor.u32 %s440_s25, %s439_s17  ;;  %p8495_p10 = pnand %p6448_p7, %p468_p9 }
  0x22   : > { %9442 = sst [smem:[#allocation21_spill]] %s9441_s18  ;;  %p442_p11 = scmp.eq.s32.totalorder %s441_s16, 0 }
  0x23   : > { %s9443_s2 = scalar_select %p8495_p10, 1, 0 }
  0x24   : > { %p8499_p12 = scmp.eq.s32.totalorder %s6446_s21, 0  ;;  %p8061_p13 = pneg %p8495_p10 }
  0x25   : > { %s8506_s22 = scalar_select %p442_p11, %s8301_s29, %s444_s24  }
  0x26   : > { %s9444_s19 = scalar_select %p8499_p12, 1, 0 }
  0x27   : > { %9445 = sst [smem:[#allocation22_spill]] %s8506_s22  ;;  %s8323_s27 = smov [#allocation4]  }
  0x28   : > { %s498_s18 = sshll.u32 %s8323_s27, 4  ;;  %p8510_p0 = pnand %p8499_p12, %p8061_p13  ;;  %s499_s18 = int_to_ptr.vmem [resolvable:$true] %s498_s18 }
  0x29   : > { %s9447_s8 = sld [smem:[#allocation26_spill]] }
  0x2a   : > { %p8165_p2 = pneg %p8510_p0 }
  0x2f   : > { %s8163_s25 = scalar_lea.hbm %s9447_s8, 512 }
  0x30   : > { %p8164_p1 = scmp.ne.s32.totalorder %s9447_s8, %s8163_s25  ;;  %p8170_p6 = scmp.lt.u32.totalorder %s8163_s25, %s9447_s8 }
  0x32   : > { %p8166_p4 = pnand %p8165_p2, %p8164_p1 }
  0x34   : > { %p8167_p5 = pneg %p8166_p4 }
  0x36   : > { %p8172_p7 = pnand %p8170_p6, %p8167_p5 }
  0x38   : > { %8175 = shalt.err (!%p8172_p7)
}
  0x39   : > { %s8176_s22 = scalar_lea.vmem %s499_s18, 512  ;;  %p8184_p8 = scmp.lt.s32.totalorder %s499_s18, %s499_s18 }
  0x3a   : > { %p8177_p9 = scmp.ne.s32.totalorder %s499_s18, %s8176_s22  ;;  %p8185_p3 = scmp.lt.s32.totalorder %s8176_s22, %s8176_s22 }
  0x3c   : > { %p8179_p11 = pnand %p8177_p9, %p8165_p2  ;;  %p8186_p12 = por %p8185_p3, %p8184_p8 }
  0x3e   : > { %p8180_p13 = pneg %p8179_p11 }
  0x40   : > { %p8187_p10 = pnand %p8186_p12, %p8180_p13 }
  0x42   : > { %8190 = shalt.err (!%p8187_p10)
}
  0x43   : > { %s8324_s1 = smov 128   ;;  %s8325_s23 = smov 8  }
  0x44   : > { %8064 = dma.hbm_to_vmem [thread:$0]  (!%p8510_p0), %s9447_s8, 512, %s499_s18, [#allocation5], %s8324_s1, %s8324_s1, %s8325_s23  }
  0x45   : > { %s8326_s25 = smov [#allocation7]   ;;  %s8191_s20 = scalar_lea.hbm %s9398_s12, 512 }
  0x46   : > { %s520_s27 = sshll.u32 %s8326_s25, 4  ;;  %p8192_p3 = scmp.ne.s32.totalorder %s9398_s12, %s8191_s20  ;;  %s521_s27 = int_to_ptr.vmem [resolvable:$true] %s520_s27 }
  0x47   : > { %p8198_p12 = scmp.lt.u32.totalorder %s8191_s20, %s9398_s12 }
  0x48   : > { %p8194_p8 = pnand %p8192_p3, %p8165_p2 }
  0x4a   : > { %p8195_p10 = pneg %p8194_p8 }
  0x4c   : > { %p8200_p1 = pnand %p8198_p12, %p8195_p10 }
  0x4e   : > { %8203 = shalt.err (!%p8200_p1)
}
  0x4f   : > { %s8204_s18 = scalar_lea.vmem %s521_s27, 512  ;;  %p8212_p7 = scmp.lt.s32.totalorder %s521_s27, %s521_s27 }
  0x50   : > { %p8205_p4 = scmp.ne.s32.totalorder %s521_s27, %s8204_s18  ;;  %p8213_p9 = scmp.lt.s32.totalorder %s8204_s18, %s8204_s18 }
  0x52   : > { %p8207_p5 = pnand %p8205_p4, %p8165_p2  ;;  %p8214_p11 = por %p8213_p9, %p8212_p7 }
  0x54   : > { %p8208_p6 = pneg %p8207_p5 }
  0x56   : > { %p8215_p13 = pnand %p8214_p11, %p8208_p6 }
  0x58   : > { %8218 = shalt.err (!%p8215_p13)
}
  0x59   : > { %8067 = dma.hbm_to_vmem [thread:$0]  (!%p8510_p0), %s9398_s12, 512, %s521_s27, [#allocation8], %s8324_s1, %s8324_s1, %s8325_s23  }
  0x5a   : > { %p9448_p3 = scmp.ne.s32.totalorder %s9443_s2, 0 }
  0x5b   : > { %p9449_p8 = scmp.ne.s32.totalorder (!%p9448_p3), %s9444_s19, 0 }
  0x5c   : > { %570 = sbr.rel (%p9448_p3) target bundleno = 3111 (0xc27), region = 92 }
  0x63   : > { %8280 = dma.done.wait (%p9449_p8), [#allocation5], 512  }
  0x64   : > { %8282 = vsyncadd (%p9449_p8), [#allocation5], 4294966784 }
  0x65   : > { %8284 = dma.done.wait (%p9449_p8), [#allocation8], 512  }
  0x66   : > { %8286 = vsyncadd (%p9449_p8), [#allocation8], 4294966784  ;;  %s9422_s13 = sand.u32 1, %s8297_s28   ;;  %p636_p0 = scmp.lt.s32.totalorder %s8309_s0, 1 }
  0x67   : > { %s8570_s15 = sshll.u32 %s9422_s13, 3  ;;  %p643_p2 = scmp.lt.s32.totalorder %s8305_s30, 1 }
  0x68   : > { %s637_s20 = scalar_select %p636_p0, %s8309_s0, 1 }
  0x69   : > { %s644_s2 = scalar_select %p643_p2, %s8305_s30, 1 }
  0x6a   : > { %s6477_s17 = sshll.u32 %s637_s20, 4  ;;  %s6458_s1 = sshll.u32 %s637_s20, 1 }
  0x6b   : > { %s9450_s16 = sld [smem:[#allocation23_spill]]  ;;  %s646_s25 = sadd.s32 %s6458_s1, %s644_s2 }
  0x6c   : > { %s6459_s27 = sshll.u32 %s646_s25, 3  ;;  %s9451_s18 = sld [smem:[#allocation24_spill]] }
  0x6d   : > { %s635_s26 = scalar_lea.vmem [#allocation9], %s8570_s15  ;;  %p6460_p10 = scmp.ne.s32.totalorder %s8305_s30, 0 }
  0x6e   : > { %v655_v0 = vld [vmem:[%s9390_s4] sm:$0xff] (!%p6460_p10)  ;;  %v656_v1 = vld [vmem:[%s9390_s4 + $0x8] sm:$0xff] (!%p6460_p10)  ;;  %vm666_vm0 = vcmask (!%p6460_p10), 261120   ;;  %v657_v7 = vld [vmem:[%s9390_s4 + $0x10] sm:$0xff] (!%p6460_p10) }
  0x6f   : > { %652 = sbr.rel (%p6460_p10) target bundleno = 385 (0x181), region = 104  ;;  %v1201_v2 = vld [vmem:[%s9392_s6] sm:$0xff] (!%p6460_p10)  ;;  %v674_v3 = vand.u32 (!%p6460_p10), 4294901760, %v655_v0  ;;  %v677_v4 = vand.u32 (!%p6460_p10), 4294901760, %v656_v1  ;;  %v1202_v5 = vld [vmem:[%s9392_s6 + $0x8] sm:$0xff] (!%p6460_p10)  ;;  %v658_v8 = vld [vmem:[%s9390_s4 + $0x18] sm:$0xff] (!%p6460_p10) }
  0x70   : > { %v1213_v6 = vand.u32 (!%p6460_p10), 4294901760, %v1201_v2  ;;  %v1216_v9 = vand.u32 (!%p6460_p10), 4294901760, %v1202_v5  ;;  %v680_v10 = vand.u32 (!%p6460_p10), 4294901760, %v657_v7  ;;  %v683_v11 = vand.u32 (!%p6460_p10), 4294901760, %v658_v8  ;;  %v1203_v12 = vld [vmem:[%s9392_s6 + $0x10] sm:$0xff] (!%p6460_p10)  ;;  %v1204_v13 = vld [vmem:[%s9392_s6 + $0x18] sm:$0xff] (!%p6460_p10) }
  0x71   : > { %s8578_s21 = scalar_lea.vmem %s9450_s16, %s6477_s17  ;;  %v8612_v15 = vpack.c.bf16 (!%p6460_p10), %v677_v4, %v674_v3  ;;  %v1219_v16 = vand.u32 (!%p6460_p10), 4294901760, %v1203_v12  ;;  %v1222_v17 = vand.u32 (!%p6460_p10), 4294901760, %v1204_v13  ;;  %v8628_v26 = vsub.f32 (!%p6460_p10), %v655_v0, %v674_v3 }
  0x72   : > { %s8583_s29 = scalar_lea.vmem %s9451_s18, %s6459_s27  ;;  %v653_v14 = vld [vmem:[%s8578_s21] sm:$0xff] (!%p6460_p10)  ;;  %v654_v19 = vld [vmem:[%s8578_s21 + $0x8] sm:$0xff] (!%p6460_p10)  ;;  %v8616_v20 = vpack.c.bf16 (!%p6460_p10), %v1216_v9, %v1213_v6  ;;  %v8618_v21 = vpack.c.bf16 (!%p6460_p10), %v683_v11, %v680_v10  ;;  %v8630_v27 = vsub.f32 (!%p6460_p10), %v656_v1, %v677_v4  ;;  %v8637_v29 = vsub.f32 (!%p6460_p10), %v1201_v2, %v1213_v6 }
  0x73   : > { %v668_v18 = vsel (!%p6460_p10), %vm666_vm0, %v653_v14, 0  ;;  %v671_v23 = vsel (!%p6460_p10), %vm666_vm0, %v654_v19, 0  ;;  %7547 = vmatprep.subr.bf16.mxu0 (!%p6460_p10), %v8612_v15  ;;  %v8624_v24 = vpack.c.bf16 (!%p6460_p10), %v1222_v17, %v1219_v16  ;;  %v8639_v30 = vsub.f32 (!%p6460_p10), %v1202_v5, %v1216_v9  ;;  %v6461_v14 = vld [vmem:[%s9391_s5] ss:$0 sm:$0xff] (!%p6460_p10) }
  0x74   : > { %v8620_v22 = vand.u32 (!%p6460_p10), 4294901760, %v668_v18  ;;  %v8626_v25 = vand.u32 (!%p6460_p10), 4294901760, %v671_v23  ;;  %7595 = vmatprep.subr.bf16.mxu1 (!%p6460_p10), %v8616_v20  ;;  %7549 = vmatpush3.bf16.msra.mxu0 (!%p6460_p10), %v8612_v15  ;;  %v765_v32 = vand.u32 (!%p6460_p10), 4294901760, %v8628_v26  ;;  %v772_v33 = vand.u32 (!%p6460_p10), 4294901760, %v8630_v27 }
  0x75   : > { %7597 = vmatpush3.bf16.msra.mxu1 (!%p6460_p10), %v8616_v20  ;;  %7551 = vmatprep.subr.bf16.mxu0 (!%p6460_p10), %v8618_v21  ;;  %v8648_v34 = vsub.f32 (!%p6460_p10), %v657_v7, %v680_v10  ;;  %v1304_v36 = vand.u32 (!%p6460_p10), 4294901760, %v8637_v29  ;;  %v1311_v37 = vand.u32 (!%p6460_p10), 4294901760, %v8639_v30  ;;  %v8656_v38 = vsub.f32 (!%p6460_p10), %v658_v8, %v683_v11 }
  0x76   : > { %v8635_v28 = vsub.f32 %v668_v18, %v8620_v22  ;;  %v8644_v31 = vsub.f32 %v671_v23, %v8626_v25  ;;  %7599 = vmatprep.subr.bf16.mxu1 %v8624_v24  ;;  %v766_v40 = vsub.f32 %v8628_v26, %v765_v32  ;;  %v773_v41 = vsub.f32 %v8630_v27, %v772_v33  ;;  %v6462_v18 = vld [vmem:[%s9393_s7] ss:$0 sm:$0xff] }
  0x77   : > { %v779_v42 = vand.u32 4294901760, %v8648_v34  ;;  %v1305_v44 = vsub.f32 %v8637_v29, %v1304_v36  ;;  %v1312_v45 = vsub.f32 %v8639_v30, %v1311_v37  ;;  %v786_v46 = vand.u32 4294901760, %v8656_v38 }
  0x78   : > { %v8652_v35 = vand.u32 4294901760, %v8635_v28  ;;  %v8659_v39 = vand.u32 4294901760, %v8644_v31  ;;  %7553 = vmatpush3.bf16.msra.mxu0 %v8618_v21  ;;  %v767_v48 = vand.u32 4294901760, %v766_v40  ;;  %v774_v49 = vand.u32 4294901760, %v773_v41 }
  0x79   : > { %7601 = vmatpush3.bf16.msra.mxu1 %v8624_v24  ;;  %v780_v50 = vsub.f32 %v8648_v34, %v779_v42  ;;  %v1306_v52 = vand.u32 4294901760, %v1305_v44  ;;  %v1313_v53 = vand.u32 4294901760, %v1312_v45  ;;  %v787_v54 = vsub.f32 %v8656_v38, %v786_v46 }
  0x7a   : > { %v745_v43 = vsub.f32 %v8635_v28, %v8652_v35  ;;  %v755_v47 = vsub.f32 %v8644_v31, %v8659_v39  ;;  %v7554_v56 = vpack.c.bf16 %v774_v49, %v767_v48  ;;  %v8687_v58 = vsub.f32 %v1203_v12, %v1219_v16 }
  0x7b   : > { %v781_v57 = vand.u32 4294901760, %v780_v50  ;;  %v7602_v59 = vpack.c.bf16 %v1313_v53, %v1306_v52  ;;  %v788_v60 = vand.u32 4294901760, %v787_v54  ;;  %v1324_v61 = vsub.f32 %v1204_v13, %v1222_v17 }
  0x7c   : > { %v746_v51 = vand.u32 4294901760, %v745_v43  ;;  %v756_v55 = vand.u32 4294901760, %v755_v47  ;;  %7555 = vmatprep.subr.bf16.mxu0 %v7554_v56  ;;  %v1318_v62 = vand.u32 4294901760, %v8687_v58  ;;  %v7562_v3 = vpack.c.bf16 %v8630_v27, %v8628_v26 }
  0x7d   : > { %7603 = vmatprep.subr.bf16.mxu1 %v7602_v59  ;;  %v7558_v63 = vpack.c.bf16 %v788_v60, %v781_v57  ;;  %v1325_v0 = vand.u32 4294901760, %v1324_v61  ;;  %v7610_v7 = vpack.c.bf16 %v8639_v30, %v8637_v29  ;;  %v7566_v8 = vpack.c.bf16 %v8656_v38, %v8648_v34 }
  0x7e   : > { %6828 = vmatprep.mubr.f32.mxu0 %v746_v51  ;;  %6894 = vmatprep.mubr.f32.mxu1 %v746_v51  ;;  %v1319_v1 = vsub.f32 %v8687_v58, %v1318_v62  ;;  %v7614_v9 = vpack.c.bf16 %v1324_v61, %v8687_v58  ;;  %v7578_v10 = vpack.c.bf16 %v772_v33, %v765_v32 }
  0x7f   : > { %6829 = vmatmul.mubr.f32.vlgmr.msra.gmra.mrb[0].mxu0 %v756_v55  ;;  %6895 = vmatmul.mubr.f32.vlgmr.msra.gmra.mrb[0].mxu1 %v756_v55  ;;  %v1326_v2 = vsub.f32 %v1324_v61, %v1325_v0  ;;  %v7626_v11 = vpack.c.bf16 %v1311_v37, %v1304_v36  ;;  %v7582_v12 = vpack.c.bf16 %v786_v46, %v779_v42 }
  0x80   : > { %7557 = vmatpush3.bf16.msra.mxu0 %v7554_v56  ;;  %7605 = vmatpush3.bf16.msra.mxu1 %v7602_v59  ;;  %v1320_v4 = vand.u32 4294901760, %v1319_v1  ;;  %v7630_v13 = vpack.c.bf16 %v1325_v0, %v1318_v62 }
  0x81   : > { %7559 = vmatprep.subr.bf16.mxu0 %v7558_v63  ;;  %6839 = vmatprep.mubr.f32.mxu0 %v8620_v22  ;;  %v1327_v5 = vand.u32 4294901760, %v1326_v2 }
  0x82   : > { %6905 = vmatprep.mubr.f32.mxu1 %v8620_v22 }
  0x83   : > { %v7606_v6 = vpack.c.bf16 %v1327_v5, %v1320_v4 }
  0x84   : > { %7561 = vmatpush3.bf16.msra.mxu0 %v7558_v63 }
  0x85   : > { %7563 = vmatprep.subr.bf16.mxu0 %v7562_v3  ;;  %7607 = vmatprep.subr.bf16.mxu1 %v7606_v6 }
  0x86   : > { %7609 = vmatpush3.bf16.msra.mxu1 %v7606_v6 }
  0x87   : > { %6840 = vmatmul.mubr.f32.vlgmr.msra.gmra.mrb[0].mxu0 %v8626_v25  ;;  %7611 = vmatprep.subr.bf16.mxu1 %v7610_v7 }
  0x88   : > { %7565 = vmatpush3.bf16.msra.mxu0 %v7562_v3  ;;  %6850 = vmatprep.mubr.f32.mxu0 %v8635_v28 }
  0x89   : > { %7567 = vmatprep.subr.bf16.mxu0 %v7566_v8  ;;  %6906 = vmatmul.mubr.f32.vlgmr.msra.gmra.mrb[0].mxu1 %v8626_v25 }
  0x8a   : > { %7613 = vmatpush3.bf16.msra.mxu1 %v7610_v7  ;;  %6916 = vmatprep.mubr.f32.mxu1 %v8635_v28 }
  0x8b   : > { %7615 = vmatprep.subr.bf16.mxu1 %v7614_v9 }
  0x8c   : > { %7569 = vmatpush3.bf16.msra.mxu0 %v7566_v8 }
  0x8d   : > { %7571 = vmatprep.subr.bf16.mxu0 %v8612_v15 }
  0x8e   : > { %7617 = vmatpush3.bf16.msra.mxu1 %v7614_v9 }
  0x8f   : > { %6851 = vmatmul.mubr.f32.vlgmr.msra.gmra.mrb[0].mxu0 %v8644_v31  ;;  %7619 = vmatprep.subr.bf16.mxu1 %v8616_v20 }
  0x90   : > { %7573 = vmatpush3.bf16.msra.mxu0 %v8612_v15  ;;  %6861 = vmatprep.mubr.f32.mxu0 %v8652_v35 }
  0x91   : > { %7575 = vmatprep.subr.bf16.mxu0 %v8618_v21  ;;  %6917 = vmatmul.mubr.f32.vlgmr.msra.gmra.mrb[0].mxu1 %v8644_v31 }
  0x92   : > { %7621 = vmatpush3.bf16.msra.mxu1 %v8616_v20  ;;  %6927 = vmatprep.mubr.f32.mxu1 %v8652_v35 }
  0x93   : > { %7623 = vmatprep.subr.bf16.mxu1 %v8624_v24 }
  0x94   : > { %7577 = vmatpush3.bf16.msra.mxu0 %v8618_v21 }
  0x95   : > { %7579 = vmatprep.subr.bf16.mxu0 %v7578_v10 }
  0x96   : > { %7625 = vmatpush3.bf16.msra.mxu1 %v8624_v24 }
  0x97   : > { %6862 = vmatmul.mubr.f32.vlgmr.msra.gmra.mrb[0].mxu0 %v8659_v39  ;;  %7627 = vmatprep.subr.bf16.mxu1 %v7626_v11 }
  0x98   : > { %7581 = vmatpush3.bf16.msra.mxu0 %v7578_v10  ;;  %6872 = vmatprep.mubr.f32.mxu0 %v8620_v22 }
  0x99   : > { %7583 = vmatprep.subr.bf16.mxu0 %v7582_v12  ;;  %6928 = vmatmul.mubr.f32.vlgmr.msra.gmra.mrb[0].mxu1 %v8659_v39 }
  0x9a   : > { %7629 = vmatpush3.bf16.msra.mxu1 %v7626_v11  ;;  %6938 = vmatprep.mubr.f32.mxu1 %v8620_v22 }
  0x9b   : > { %7631 = vmatprep.subr.bf16.mxu1 %v7630_v13 }
  0x9c   : > { %7585 = vmatpush3.bf16.msra.mxu0 %v7582_v12 }
  0x9d   : > { %7587 = vmatprep.subr.bf16.mxu0 %v8612_v15 }
  0x9e   : > { %7633 = vmatpush3.bf16.msra.mxu1 %v7630_v13 }
  0x9f   : > { %6873 = vmatmul.mubr.f32.vlgmr.msra.gmra.mrb[0].mxu0 %v8626_v25  ;;  %7635 = vmatprep.subr.bf16.mxu1 %v8616_v20 }
  0xa0   : > { %7589 = vmatpush3.bf16.msra.mxu0 %v8612_v15  ;;  %6883 = vmatprep.mubr.f32.mxu0 %v8620_v22 }
  0xa1   : > { %7591 = vmatprep.subr.bf16.mxu0 %v8618_v21  ;;  %6939 = vmatmul.mubr.f32.vlgmr.msra.gmra.mrb[0].mxu1 %v8626_v25 }
  0xa2   : > { %7637 = vmatpush3.bf16.msra.mxu1 %v8616_v20  ;;  %6949 = vmatprep.mubr.f32.mxu1 %v8620_v22 }
  0xa3   : > { %7639 = vmatprep.subr.bf16.mxu1 %v8624_v24 }
  0xa4   : > { %7593 = vmatpush3.bf16.msra.mxu0 %v8618_v21 }
  0xa6   : > { %7641 = vmatpush3.bf16.msra.mxu1 %v8624_v24 }
  0xa7   : > { %6884 = vmatmul.mubr.f32.vlgmr.msra.gmra.mrb[0].mxu0 %v8626_v25 }
  0xa9   : > { %6950 = vmatmul.mubr.f32.vlgmr.msra.gmra.mrb[0].mxu1 %v8626_v25 }
 0x17a   : > { %v6885_v15 = vpop.f32.mrb[0].mxu0 }
 0x17b   : > { %v7966_v16 = vadd.f32 %v6885_v15, %v6461_v14  ;;  %v1191_v17 = vpop.f32.mrb[1].mxu0 }
 0x17c   : > { %v7967_v19 = vadd.f32 %v6461_v14, %v1191_v17  ;;  %v6951_v20 = vpop.f32.mrb[0].mxu1 }
 0x17d   : > { %1741 = vst.msk [vmem:[#allocation2 + $0x8] sm:$0xff] %vm666_vm0, %v7966_v16  ;;  %v7968_v21 = vadd.f32 %v6951_v20, %v6462_v18  ;;  %v1730_v22 = vpop.f32.mrb[1].mxu1 }
 0x17e   : > { %1740 = vst.msk [vmem:[#allocation2] sm:$0xff] %vm666_vm0, %v7967_v19  ;;  %v7969_v23 = vadd.f32 %v6462_v18, %v1730_v22 }
 0x17f   : > { %1743 = vst.msk [vmem:[#allocation3 + $0x8] sm:$0xff] %vm666_vm0, %v7968_v21 }
 0x180   : > { %1742 = vst.msk [vmem:[#allocation3] sm:$0xff] %vm666_vm0, %v7969_v23 }
 0x181 PF: > { %s9452_s8 = sld [smem:[#allocation25_spill]]  ;;  %v8327_v27 = vmov 0.0|0.0   ;;  %vm8328_vm1 = vmmov 0   ;;  %v8329_v32 = vmov 0.0   ;;  %s6463_s18 = sshll.u32 %s8305_s30, 3  ;;  %vm1774_vm2 = vcmask 261120  }
 0x182   : > { %7642 = vmatprep.subr.bf16.mxu0 %v8327_v27  ;;  %6960 = vmatprep.mubr.msk.f32.mxu0 %vm8328_vm1, %v8329_v32  ;;  %s1745_s20 = scalar_lea.vmem %s8578_s21, %s6463_s18  ;;  %vm2263_vm3 = vcmask 130048   ;;  %s8330_s23 = smov 112  }
 0x183   : > { %7681 = vmatprep.subr.bf16.mxu1 %v8327_v27  ;;  %7029 = vmatprep.mubr.msk.f32.mxu1 %vm8328_vm1, %v8329_v32  ;;  %v8784_v39 = vld [vmem:[%s1745_s20] sm:$0xff]  ;;  %s9453_s18 = sld [smem:[#allocation27_spill]]  ;;  %s9454_s21 = sld [smem:[#allocation28_spill]] }
 0x184   : > { %v1776_v42 = vsel %vm1774_vm2, %v8784_v39, 0  ;;  %v1761_v50 = vld [vmem:[#allocation2 + $0x8] sm:$0xff]  ;;  %s6473_s2 = sshll.u32 %s8309_s0, 1  ;;  %s9456_s13 = sld [smem:[#allocation29_spill]] }
 0x185   : > { %v1760_v34 = vld [vmem:[#allocation2] sm:$0xff]  ;;  %v8797_v44 = vand.u32 4294901760, %v1776_v42  ;;  %v2271_v60 = vsel %vm2263_vm3, %v1761_v50, 0  ;;  %s6328_s17 = sadd.s32 %s8305_s30, %s6473_s2  ;;  %s9457_s27 = sld [smem:[#allocation30_spill]] }
 0x186   : > { %3209 = vrot.lane.b32.xlu0 %v1760_v34, %s8330_s23  ;;  %v8794_v43 = vsel %vm2263_vm3, %v1760_v34, 0  ;;  %v2277_v63 = vand.u32 4294901760, %v2271_v60  ;;  %s6474_s24 = sshll.u32 %s6328_s17, 7  ;;  %s6332_s22 = sshll.u32 %s635_s26, 4  ;;  %s9330_s22 = int_to_ptr.vmem [resolvable:$true] %s6332_s22 }
 0x187   : > { %v1764_v24 = vld [vmem:[%s9452_s8] sm:$0xff]  ;;  %v1765_v25 = vld [vmem:[%s9452_s8 + $0x8] sm:$0xff]  ;;  %v1766_v26 = vld [vmem:[%s9452_s8 + $0x10] sm:$0xff]  ;;  %v2274_v49 = vand.u32 4294901760, %v8794_v43  ;;  %v1848_v51 = vsub.f32 %v1776_v42, %v8797_v44  ;;  %s9458_s0 = sld [smem:[#allocation31_spill]]  ;;  %s9460_s30 = sand.u32 1, %s8297_s28  }
 0x188   : > { %v1779_v28 = vand.u32 4294901760, %v1764_v24  ;;  %v1782_v29 = vand.u32 4294901760, %v1765_v25  ;;  %v1767_v30 = vld [vmem:[%s9452_s8 + $0x18] sm:$0xff]  ;;  %v1785_v31 = vand.u32 4294901760, %v1766_v26  ;;  %v8820_v4 = vsub.f32 %v2271_v60, %v2277_v63  ;;  %s6317_s2 = scalar_lea.sflag [#allocation6], %s9460_s30  ;;  %s8219_s17 = scalar_lea.vmem %s9330_s22, 128 }
 0x189   : > { %v1788_v33 = vand.u32 4294901760, %v1767_v30  ;;  %v8814_v56 = vsub.f32 %v8794_v43, %v2274_v49  ;;  %v1849_v57 = vand.u32 4294901760, %v1848_v51  ;;  %v7679_v16 = vpack.c.bf16 %v2277_v63, %v2274_v49  ;;  %p8220_p12 = scmp.ne.s32.totalorder %s9330_s22, %s8219_s17  ;;  %s8331_s1 = smov [#allocation9]  }
 0x18a   : > { %v8776_v35 = vpack.c.bf16 %v1782_v29, %v1779_v28  ;;  %v8778_v36 = vsub.f32 %v1764_v24, %v1779_v28  ;;  %v8780_v37 = vsub.f32 %v1765_v25, %v1782_v29  ;;  %v8782_v38 = vsub.f32 %v1766_v26, %v1785_v31  ;;  %3211 = vrot.lane.b32.xlu0 %v1761_v50, %s8330_s23  ;;  %s8223_s19 = sshll.u32 %s8331_s1, 4  ;;  %s8224_s19 = int_to_ptr.vmem [resolvable:$false] %s8223_s19 }
 0x18b   : > { %v8787_v40 = vpack.c.bf16 %v1788_v33, %v1785_v31  ;;  %v8789_v41 = vsub.f32 %v1767_v30, %v1788_v33  ;;  %v2353_v61 = vand.u32 4294901760, %v8814_v56  ;;  %v1850_v62 = vsub.f32 %v1848_v51, %v1849_v57  ;;  %p8226_p6 = scmp.lt.s32.totalorder %s9330_s22, %s8224_s19 }
 0x18c   : > { %7644 = vmatpush3.bf16.msra.mxu0 %v8776_v35  ;;  %v1860_v45 = vand.u32 4294901760, %v8778_v36  ;;  %v1867_v46 = vand.u32 4294901760, %v8780_v37  ;;  %v1874_v47 = vand.u32 4294901760, %v8782_v38  ;;  %v2360_v6 = vand.u32 4294901760, %v8820_v4 }
 0x18d   : > { %7645 = vmatprep.subr.bf16.mxu0 %v8327_v27  ;;  %v1881_v48 = vand.u32 4294901760, %v8789_v41  ;;  %v1851_v3 = vand.u32 4294901760, %v1850_v62  ;;  %v2354_v5 = vsub.f32 %v8814_v56, %v2353_v61  ;;  %v7655_v11 = vpack.c.bf16 %v8780_v37, %v8778_v36  ;;  %v1747_v62 = vld [vmem:[%s8583_s29] sm:$0xff]  ;;  %s9455_s29 = sld [smem:[#allocation19_spill]] }
 0x18e   : > { %v1861_v52 = vsub.f32 %v8778_v36, %v1860_v45  ;;  %v1868_v53 = vsub.f32 %v8780_v37, %v1867_v46  ;;  %v1875_v54 = vsub.f32 %v8782_v38, %v1874_v47  ;;  %v2361_v9 = vsub.f32 %v8820_v4, %v2360_v6  ;;  %v6464_v36 = vld [vmem:[%s9389_s3] ss:$0 sm:$0xff] }
 0x18f   : > { %v1882_v55 = vsub.f32 %v8789_v41, %v1881_v48  ;;  %v2355_v8 = vand.u32 4294901760, %v2354_v5  ;;  %v7658_v13 = vpack.c.bf16 %v8789_v41, %v8782_v38  ;;  %v7667_v14 = vpack.c.bf16 %v1867_v46, %v1860_v45 }
 0x190   : > { %7647 = vmatpush3.bf16.msra.mxu0 %v8787_v40  ;;  %v1862_v58 = vand.u32 4294901760, %v1861_v52  ;;  %v1869_v59 = vand.u32 4294901760, %v1868_v53  ;;  %v1876_v1 = vand.u32 4294901760, %v1875_v54  ;;  %v2362_v10 = vand.u32 4294901760, %v2361_v9 }
 0x191   : > { %7648 = vmatprep.subr.bf16.mxu0 %v8327_v27  ;;  %v1883_v2 = vand.u32 4294901760, %v1882_v55  ;;  %v7670_v15 = vpack.c.bf16 %v1881_v48, %v1874_v47  ;;  %v7685_v42 = vpack.c.bf16 %v8820_v4, %v8814_v56  ;;  %v7691_v48 = vpack.c.bf16 %v2360_v6, %v2353_v61 }
 0x192   : > { %v7649_v0 = vpack.c.bf16 %v1869_v59, %v1862_v58  ;;  %v7682_v12 = vpack.c.bf16 %v2362_v10, %v2355_v8 }
 0x193   : > { %6961 = vmatmul.mubr.f32.vlgmr.msra.gmra.mrb[0].mxu0 %v1851_v3  ;;  %v7652_v7 = vpack.c.bf16 %v1883_v2, %v1876_v1  ;;  %p9461_p1 = scmp.ne.s32.totalorder %s9455_s29, 0 }
 0x194   : > { %7650 = vmatpush3.bf16.msra.mxu0 %v7649_v0  ;;  %6971 = vmatprep.mubr.msk.f32.mxu0 %vm8328_vm1, %v8329_v32 }
 0x195   : > { %7651 = vmatprep.subr.bf16.mxu0 %v8327_v27  ;;  %7683 = vmatpush3.bf16.xpose.msra.mxu1 %v7682_v12  ;;  %v1762_v12 = vld [vmem:[#allocation3] sm:$0xff]  ;;  %p8221_p4 = pnand %p8220_p12, %p9461_p1 }
 0x196   : > { %7684 = vmatprep.subr.bf16.mxu1 %v8327_v27 }
 0x197   : > { %p8222_p5 = pneg %p8221_p4 }
 0x198   : > { %7653 = vmatpush3.bf16.msra.mxu0 %v7652_v7 }
 0x199   : > { %7654 = vmatprep.subr.bf16.mxu0 %v8327_v27 }
 0x19b   : > { %6972 = vmatmul.mubr.f32.vlgmr.msra.gmra.mrb[0].mxu0 %v8797_v44 }
 0x19c   : > { %7656 = vmatpush3.bf16.msra.mxu0 %v7655_v11  ;;  %6982 = vmatprep.mubr.msk.f32.mxu0 %vm8328_vm1, %v8329_v32 }
 0x19d   : > { %7657 = vmatprep.subr.bf16.mxu0 %v8327_v27 }
 0x1a0   : > { %7659 = vmatpush3.bf16.msra.mxu0 %v7658_v13  ;;  %v1763_v13 = vld [vmem:[#allocation3 + $0x8] sm:$0xff] }
 0x1a1   : > { %7660 = vmatprep.subr.bf16.mxu0 %v8327_v27 }
 0x1a3   : > { %6983 = vmatmul.mubr.f32.vlgmr.msra.gmra.mrb[0].mxu0 %v1848_v51 }
 0x1a4   : > { %7662 = vmatpush3.bf16.msra.mxu0 %v8776_v35  ;;  %6993 = vmatprep.mubr.msk.f32.mxu0 %vm8328_vm1, %v8329_v32 }
 0x1a5   : > { %7663 = vmatprep.subr.bf16.mxu0 %v8327_v27 }
 0x1a8   : > { %7665 = vmatpush3.bf16.msra.mxu0 %v8787_v40 }
 0x1a9   : > { %7666 = vmatprep.subr.bf16.mxu0 %v8327_v27 }
 0x1ab   : > { %6994 = vmatmul.mubr.f32.vlgmr.msra.gmra.mrb[0].mxu0 %v1849_v57 }
 0x1ac   : > { %7668 = vmatpush3.bf16.msra.mxu0 %v7667_v14  ;;  %7004 = vmatprep.mubr.msk.f32.mxu0 %vm8328_vm1, %v8329_v32  ;;  %v2749_v14 = vand.u32 4294901760, %v1762_v12 }
 0x1ad   : > { %7669 = vmatprep.subr.bf16.mxu0 %v8327_v27 }
 0x1b0   : > { %7671 = vmatpush3.bf16.msra.mxu0 %v7670_v15  ;;  %v2752_v15 = vand.u32 4294901760, %v1763_v13 }
 0x1b1   : > { %7672 = vmatprep.subr.bf16.mxu0 %v8327_v27 }
 0x1b3   : > { %7005 = vmatmul.mubr.f32.vlgmr.msra.gmra.mrb[0].mxu0 %v8797_v44 }
 0x1b4   : > { %7674 = vmatpush3.bf16.msra.mxu0 %v8776_v35  ;;  %7015 = vmatprep.mubr.msk.f32.mxu0 %vm8328_vm1, %v8329_v32 }
 0x1b5   : > { %7675 = vmatprep.subr.bf16.mxu0 %v8327_v27 }
 0x1b8   : > { %7677 = vmatpush3.bf16.msra.mxu0 %v8787_v40 }
 0x1b9   : > { %7678 = vmatprep.subr.bf16.mxu0 %v8327_v27 }
 0x1bb   : > { %7016 = vmatmul.mubr.f32.vlgmr.msra.gmra.mrb[0].mxu0 %v8797_v44 }
 0x1bc   : > { %7022 = vmatprep.mubr.msk.f32.mxu0 %vm8328_vm1, %v8329_v32 }
 0x1c1   : > { %7680 = vmatpush3.bf16.xpose.msra.mxu0 %v7679_v16 }
 0x1c2   : > { %7696 = vmatprep.subr.bf16.mxu0 %v8327_v27 }
 0x1f8   : > { %v3210_v17 = vpop.permute.xlu0 %3209 }
 0x1f9   : > { %v3215_v18 = vsel %vm2263_vm3, %v3210_v17, 0  ;;  %v2827_v17 = vsub.f32 %v1762_v12, %v2749_v14 }
 0x1fa   : > { %v3220_v19 = vand.u32 4294901760, %v3215_v18 }
 0x1fc   : > { %v3298_v20 = vsub.f32 %v3215_v18, %v3220_v19  ;;  %v3212_v21 = vpop.permute.xlu0 %3211  ;;  %v2834_v18 = vsub.f32 %v1763_v13, %v2752_v15 }
 0x1fd   : > { %v3217_v22 = vsel %vm2263_vm3, %v3212_v21, 0 }
 0x1fe   : > { %v3223_v23 = vand.u32 4294901760, %v3217_v22  ;;  %v3299_v26 = vand.u32 4294901760, %v3298_v20 }
 0x200   : > { %v3305_v24 = vsub.f32 %v3217_v22, %v3223_v23  ;;  %v3300_v29 = vsub.f32 %v3298_v20, %v3299_v26  ;;  %v7715_v49 = vpack.c.bf16 %v3223_v23, %v3220_v19  ;;  %v2828_v19 = vand.u32 4294901760, %v2827_v17 }
 0x202   : > { %v7721_v25 = vpack.c.bf16 %v3305_v24, %v3298_v20  ;;  %v3306_v28 = vand.u32 4294901760, %v3305_v24  ;;  %v3301_v31 = vand.u32 4294901760, %v3300_v29  ;;  %v2835_v20 = vand.u32 4294901760, %v2834_v18 }
 0x203   : > { %v2829_v21 = vsub.f32 %v2827_v17, %v2828_v19 }
 0x204   : > { %v3307_v30 = vsub.f32 %v3305_v24, %v3306_v28  ;;  %v7727_v34 = vpack.c.bf16 %v3306_v28, %v3299_v26  ;;  %v2836_v22 = vsub.f32 %v2834_v18, %v2835_v20  ;;  %v7703_v26 = vpack.c.bf16 %v2834_v18, %v2827_v17 }
 0x205   : > { %v2830_v23 = vand.u32 4294901760, %v2829_v21  ;;  %v7709_v28 = vpack.c.bf16 %v2835_v20, %v2828_v19 }
 0x206   : > { %v3308_v33 = vand.u32 4294901760, %v3307_v30  ;;  %v2837_v24 = vand.u32 4294901760, %v2836_v22 }
 0x208   : > { %v7718_v35 = vpack.c.bf16 %v3308_v33, %v3301_v31 }
 0x28e   : > { %v2259_v37 = vpop.f32.mrb[0].mxu0 }
 0x28f   : > { %v7990_v38 = vadd.f32 %v6464_v36, %v2259_v37  ;;  %v7017_v40 = vpop.f32.mrb[1].mxu0 }
 0x291   : > { %v2265_v41 = vsel %vm2263_vm3, %v7990_v38, 0  ;;  %3207 = vrot.lane.b32.xlu1 %v7990_v38, %s8330_s23 }
 0x292   : > { %v2340_v43 = vand.u32 4294901760, %v2265_v41 }
 0x294   : > { %v2341_v44 = vsub.f32 %v2265_v41, %v2340_v43  ;;  %7030 = vmatmul.mubr.f32.vlgmr.msra.gmra.mrb[0].mxu1 %v2340_v43 }
 0x295   : > { %7686 = vmatpush3.bf16.xpose.msra.mxu1 %v7685_v42  ;;  %7036 = vmatprep.mubr.msk.f32.mxu1 %vm8328_vm1, %v8329_v32 }
 0x296   : > { %v2342_v45 = vand.u32 4294901760, %v2341_v44  ;;  %7687 = vmatprep.subr.bf16.mxu1 %v8327_v27 }
 0x298   : > { %v2343_v46 = vsub.f32 %v2341_v44, %v2342_v45 }
 0x29a   : > { %v2344_v47 = vand.u32 4294901760, %v2343_v46 }
 0x29c   : > { %7023 = vmatmul.mubr.f32.vlgmr.msra.gmra.mrb[2].mxu0 %v2344_v47  ;;  %7037 = vmatmul.mubr.f32.vlgmr.msra.gmra.mrb[0].mxu1 %v2341_v44 }
 0x29d   : > { %7689 = vmatpush3.bf16.xpose.msra.mxu1 %v7679_v16  ;;  %7043 = vmatprep.mubr.msk.f32.mxu1 %vm8328_vm1, %v8329_v32 }
 0x29e   : > { %7690 = vmatprep.subr.bf16.mxu1 %v8327_v27  ;;  %7064 = vmatprep.mubr.msk.f32.mxu0 %vm8328_vm1, %v8329_v32 }
 0x2a4   : > { %7044 = vmatmul.mubr.f32.vlgmr.msra.gmra.mrb[0].mxu1 %v2342_v45 }
 0x2a5   : > { %7692 = vmatpush3.bf16.xpose.msra.mxu1 %v7691_v48  ;;  %7050 = vmatprep.mubr.msk.f32.mxu1 %vm8328_vm1, %v8329_v32 }
 0x2a6   : > { %7693 = vmatprep.subr.bf16.mxu1 %v8327_v27 }
 0x2ac   : > { %7051 = vmatmul.mubr.f32.vlgmr.msra.gmra.mrb[0].mxu1 %v2340_v43 }
 0x2ad   : > { %7695 = vmatpush3.bf16.xpose.msra.mxu1 %v7679_v16  ;;  %7057 = vmatprep.mubr.msk.f32.mxu1 %vm8328_vm1, %v8329_v32  ;;  %v7697_v16 = vpack.c.bf16 %v2752_v15, %v2749_v14 }
 0x2ae   : > { %7714 = vmatprep.subr.bf16.mxu1 %v8327_v27 }
 0x2af   : > { %7698 = vmatpush3.bf16.msra.mxu0 %v7697_v16 }
 0x2b0   : > { %7699 = vmatprep.subr.bf16.mxu0 %v8327_v27 }
 0x2b4   : > { %7058 = vmatmul.mubr.f32.vlgmr.msra.gmra.mrb[0].mxu1 %v2340_v43 }
 0x2b5   : > { %7716 = vmatpush3.bf16.xpose.msra.mxu1 %v7715_v49  ;;  %7106 = vmatprep.mubr.msk.f32.mxu1 %vm8328_vm1, %v8329_v32 }
 0x2b6   : > { %7717 = vmatprep.subr.bf16.mxu1 %v8327_v27 }
 0x303   : > { %v3208_v50 = vpop.permute.xlu1 %3207 }
 0x304   : > { %v3213_v51 = vsel %vm2263_vm3, %v3208_v50, 0 }
 0x305   : > { %v3286_v52 = vand.u32 4294901760, %v3213_v51 }
 0x307   : > { %v3287_v53 = vsub.f32 %v3213_v51, %v3286_v52 }
 0x309   : > { %v3288_v54 = vand.u32 4294901760, %v3287_v53 }
 0x30b   : > { %v3289_v55 = vsub.f32 %v3287_v53, %v3288_v54 }
 0x30d   : > { %v3290_v56 = vand.u32 4294901760, %v3289_v55 }
 0x30f   : > { %7107 = vmatmul.mubr.f32.vlgmr.msra.gmra.mrb[2].mxu1 %v3290_v56 }
 0x310   : > { %7719 = vmatpush3.bf16.xpose.msra.mxu1 %v7718_v35  ;;  %7113 = vmatprep.mubr.msk.f32.mxu1 %vm8328_vm1, %v8329_v32 }
 0x311   : > { %7720 = vmatprep.subr.bf16.mxu1 %v8327_v27 }
 0x317   : > { %7114 = vmatmul.mubr.f32.vlgmr.msra.gmra.mrb[2].mxu1 %v3286_v52 }
 0x318   : > { %7722 = vmatpush3.bf16.xpose.msra.mxu1 %v7721_v25  ;;  %7120 = vmatprep.mubr.msk.f32.mxu1 %vm8328_vm1, %v8329_v32  ;;  %v7700_v25 = vpack.c.bf16 %v2837_v24, %v2830_v23  ;;  %v1756_v24 = vld [vmem:[#allocation4] sm:$0xff] }
 0x319   : > { %7723 = vmatprep.subr.bf16.mxu1 %v8327_v27 }
 0x31f   : > { %7121 = vmatmul.mubr.f32.vlgmr.msra.gmra.mrb[2].mxu1 %v3287_v53 }
 0x320   : > { %7725 = vmatpush3.bf16.xpose.msra.mxu1 %v7715_v49  ;;  %7127 = vmatprep.mubr.msk.f32.mxu1 %vm8328_vm1, %v8329_v32 }
 0x321   : > { %7726 = vmatprep.subr.bf16.mxu1 %v8327_v27 }
 0x327   : > { %7128 = vmatmul.mubr.f32.vlgmr.msra.gmra.mrb[2].mxu1 %v3288_v54 }
 0x328   : > { %7728 = vmatpush3.bf16.xpose.msra.mxu1 %v7727_v34  ;;  %7134 = vmatprep.mubr.msk.f32.mxu1 %vm8328_vm1, %v8329_v32 }
 0x329   : > { %7729 = vmatprep.subr.bf16.mxu1 %v8327_v27 }
 0x32f   : > { %7135 = vmatmul.mubr.f32.vlgmr.msra.gmra.mrb[2].mxu1 %v3286_v52 }
 0x330   : > { %7731 = vmatpush3.bf16.xpose.msra.mxu1 %v7715_v49  ;;  %7141 = vmatprep.mubr.msk.f32.mxu1 %vm8328_vm1, %v8329_v32 }
 0x331   : > { %7753 = vmatprep.subr.bf16.mxu1 %v8327_v27 }
 0x337   : > { %7142 = vmatmul.mubr.f32.vlgmr.msra.gmra.mrb[2].mxu1 %v3286_v52 }
 0x338   : > { %7197 = vmatprep.mubr.msk.f32.mxu1 %vm8328_vm1, %v8329_v32 }
 0x36f   : > { %v2346_v57 = vpop.f32.mrb[2].mxu0 }
 0x370   : > { %v7024_v58 = vpop.f32.mrb[3].mxu0 }
 0x387   : > { %v2728_v59 = vpop.f32.mrb[0].mxu1 }
 0x388   : > { %v7991_v60 = vadd.f32 %v2728_v59, %v2346_v57  ;;  %v7059_v61 = vpop.f32.mrb[1].mxu1 }
 0x38a   : > { %v2732_v63 = vmul.f32 0.25, %v7991_v60 }
 0x38c   : > { %v2733_v0 = vadd.f32 %v2732_v63, %v1747_v62 }
 0x38e   : > { %v2734_v1 = vsel %vm2263_vm3, %v2733_v0, -inf }
 0x38f   : > { %2735 = vmax.xlane.f32.xlu1 %v2734_v1 }
 0x40a   : > { %v3674_v2 = vpop.f32.mrb[2].mxu1 }
 0x40b   : > { %v3678_v3 = vmul.f32 0.25, %v3674_v2  ;;  %v7143_v4 = vpop.f32.mrb[3].mxu1 }
 0x40d   : > { %v3679_v5 = vadd.f32 %v3678_v3, %v1747_v62 }
 0x40f   : > { %v3680_v6 = vsel %vm2263_vm3, %v3679_v5, -inf }
 0x410   : > { %3681 = vmax.xlane.f32.xlu0 %v3680_v6  ;;  %v1758_v6 = vld [vmem:[#allocation4 + $0x10] sm:$0xff] }
 0x41c   : > { %v2736_v7 = vpop.xlane.xlu1 %2735 }
 0x41d   : > { %v2737_v8 = vsub.f32 %v2733_v0, %v2736_v7  ;;  %v1759_v7 = vld [vmem:[#allocation4 + $0x18] sm:$0xff] }
 0x41f   : > { %v2738_v9 = vmul.f32 1.442695, %v2737_v8  ;;  %v4165_v8 = vand.u32 4294901760, %v1758_v6 }
 0x421   : > { %8149 = vpow2.f32 %v2738_v9  ;;  %v4168_v9 = vand.u32 4294901760, %v1759_v7 }
 0x423   : > { %v7751_v21 = vpack.c.bf16 %v4168_v9, %v4165_v8 }
 0x42b   : > { %v8150_v10 = vpop.eup %8149 }
 0x42c   : > { %v2740_v11 = vsel %vm2263_vm3, %v8150_v10, 0.0 }
 0x42d   : > { %2741 = vadd.xlane.f32.xlu0 %v2740_v11  ;;  %v4250_v11 = vsub.f32 %v1759_v7, %v4168_v9 }
 0x443   : > { %3693 = vrot.lane.b32.xlu0 %v1762_v12, %s8330_s23 }
 0x49d   : > { %v3682_v29 = vpop.xlane.xlu0 %3681 }
 0x49e   : > { %v3683_v30 = vsub.f32 %v3679_v5, %v3682_v29 }
 0x4a0   : > { %v3684_v31 = vmul.f32 1.442695, %v3683_v30 }
 0x4a2   : > { %8151 = vpow2.f32 %v3684_v31 }
 0x4ac   : > { %v8152_v33 = vpop.eup %8151 }
 0x4ad   : > { %v3686_v34 = vsel %vm2263_vm3, %v8152_v33, 0.0 }
 0x4ae   : > { %3687 = vadd.xlane.f32.xlu1 %v3686_v34 }
 0x4ba   : > { %v2742_v35 = vpop.xlane.xlu0 %2741 }
 0x4bb   : > { %8153 = vrcp.f32 %v2742_v35 }
 0x4be   : > { %v3694_v45 = vpop.permute.xlu0 %3693 }
 0x4bf   : > { %3695 = vrot.lane.b32.xlu1 %v1763_v13, %s8330_s23  ;;  %v3703_v47 = vand.u32 4294901760, %v3694_v45  ;;  %v4251_v13 = vand.u32 4294901760, %v4250_v11  ;;  %s9459_s23 = smov %s9458_s0 }
 0x4c1   : > { %v3781_v50 = vsub.f32 %v3694_v45, %v3703_v47  ;;  %v4252_v15 = vsub.f32 %v4250_v11, %v4251_v13 }
 0x4c3   : > { %v3782_v53 = vand.u32 4294901760, %v3781_v50  ;;  %v4253_v17 = vand.u32 4294901760, %v4252_v15 }
 0x4c5   : > { %v8154_v36 = vpop.eup %8153  ;;  %v3783_v57 = vsub.f32 %v3781_v50, %v3782_v53 }
 0x4c6   : > { %v2744_v37 = vmul.f32 %v8154_v36, %v8150_v10  ;;  %v4243_v10 = vsub.f32 %v1758_v6, %v4165_v8 }
 0x4c7   : > { %v3784_v62 = vand.u32 4294901760, %v3783_v57 }
 0x4c8   : > { %v2746_v38 = vsel %vm2263_vm3, %v2744_v37, 0  ;;  %v4244_v12 = vand.u32 4294901760, %v4243_v10  ;;  %v7757_v22 = vpack.c.bf16 %v4250_v11, %v4243_v10 }
 0x4c9   : > { %v2815_v40 = vand.u32 4294901760, %v2746_v38 }
 0x4ca   : > { %v4245_v14 = vsub.f32 %v4243_v10, %v4244_v12  ;;  %v7763_v23 = vpack.c.bf16 %v4251_v13, %v4244_v12 }
 0x4cb   : > { %v2816_v41 = vsub.f32 %v2746_v38, %v2815_v40 }
 0x4cd   : > { %v2817_v42 = vand.u32 4294901760, %v2816_v41 }
 0x4cf   : > { %v2818_v43 = vsub.f32 %v2816_v41, %v2817_v42 }
 0x4d1   : > { %v2819_v44 = vand.u32 4294901760, %v2818_v43 }
 0x4d3   : > { %7065 = vmatmul.mubr.f32.vlgmr.msra.gmra.mrb[4].mxu0 %v2819_v44 }
 0x4d4   : > { %7701 = vmatpush3.bf16.msra.mxu0 %v7700_v25  ;;  %7071 = vmatprep.mubr.msk.f32.mxu0 %vm8328_vm1, %v8329_v32  ;;  %v1757_v25 = vld [vmem:[#allocation4 + $0x8] sm:$0xff] }
 0x4d5   : > { %7702 = vmatprep.subr.bf16.mxu0 %v8327_v27 }
 0x4db   : > { %7072 = vmatmul.mubr.f32.vlgmr.msra.gmra.mrb[4].mxu0 %v2815_v40 }
 0x4dc   : > { %7704 = vmatpush3.bf16.msra.mxu0 %v7703_v26  ;;  %7078 = vmatprep.mubr.msk.f32.mxu0 %vm8328_vm1, %v8329_v32  ;;  %v4627_v26 = vand.u32 4294901760, %v1756_v24 }
 0x4dd   : > { %7705 = vmatprep.subr.bf16.mxu0 %v8327_v27 }
 0x4de   : > { %v4705_v29 = vsub.f32 %v1756_v24, %v4627_v26 }
 0x4e0   : > { %v4706_v31 = vand.u32 4294901760, %v4705_v29 }
 0x4e2   : > { %v4707_v37 = vsub.f32 %v4705_v29, %v4706_v31 }
 0x4e3   : > { %7079 = vmatmul.mubr.f32.vlgmr.msra.gmra.mrb[4].mxu0 %v2816_v41 }
 0x4e4   : > { %7707 = vmatpush3.bf16.msra.mxu0 %v7697_v16  ;;  %7085 = vmatprep.mubr.msk.f32.mxu0 %vm8328_vm1, %v8329_v32  ;;  %v4708_v43 = vand.u32 4294901760, %v4707_v37 }
 0x4e5   : > { %7708 = vmatprep.subr.bf16.mxu0 %v8327_v27 }
 0x4eb   : > { %7086 = vmatmul.mubr.f32.vlgmr.msra.gmra.mrb[4].mxu0 %v2817_v42 }
 0x4ec   : > { %7710 = vmatpush3.bf16.msra.mxu0 %v7709_v28  ;;  %7092 = vmatprep.mubr.msk.f32.mxu0 %vm8328_vm1, %v8329_v32  ;;  %v4630_v28 = vand.u32 4294901760, %v1757_v25 }
 0x4ed   : > { %7711 = vmatprep.subr.bf16.mxu0 %v8327_v27 }
 0x4ee   : > { %v4712_v30 = vsub.f32 %v1757_v25, %v4630_v28 }
 0x4f3   : > { %7093 = vmatmul.mubr.f32.vlgmr.msra.gmra.mrb[4].mxu0 %v2815_v40 }
 0x4f4   : > { %7713 = vmatpush3.bf16.msra.mxu0 %v7697_v16  ;;  %7099 = vmatprep.mubr.msk.f32.mxu0 %vm8328_vm1, %v8329_v32  ;;  %v4246_v16 = vand.u32 4294901760, %v4245_v14 }
 0x4f5   : > { %7732 = vmatprep.subr.bf16.mxu0 %v8327_v27 }
 0x4f6   : > { %v7754_v20 = vpack.c.bf16 %v4253_v17, %v4246_v16 }
 0x4f8   : > { %7755 = vmatpush3.bf16.msra.mxu1 %v7754_v20 }
 0x4f9   : > { %7759 = vmatprep.subr.bf16.mxu1 %v8327_v27 }
 0x4fb   : > { %7100 = vmatmul.mubr.f32.vlgmr.msra.gmra.mrb[4].mxu0 %v2815_v40 }
 0x4fc   : > { %7148 = vmatprep.mubr.msk.f32.mxu0 %vm8328_vm1, %v8329_v32 }
 0x53b   : > { %v3688_v46 = vpop.xlane.xlu1 %3687 }
 0x53c   : > { %8155 = vrcp.f32 %v3688_v46 }
 0x53f   : > { %v3696_v48 = vpop.permute.xlu1 %3695 }
 0x540   : > { %v3706_v49 = vand.u32 4294901760, %v3696_v48 }
 0x542   : > { %v7733_v51 = vpack.c.bf16 %v3706_v49, %v3703_v47  ;;  %v3788_v52 = vsub.f32 %v3696_v48, %v3706_v49 }
 0x544   : > { %7734 = vmatpush3.bf16.msra.mxu0 %v7733_v51  ;;  %v3789_v54 = vand.u32 4294901760, %v3788_v52  ;;  %v7739_v4 = vpack.c.bf16 %v3788_v52, %v3781_v50 }
 0x545   : > { %7735 = vmatprep.subr.bf16.mxu0 %v8327_v27 }
 0x546   : > { %v8156_v55 = vpop.eup %8155  ;;  %v3790_v58 = vsub.f32 %v3788_v52, %v3789_v54  ;;  %v7745_v5 = vpack.c.bf16 %v3789_v54, %v3782_v53  ;;  %v7775_v54 = vpack.c.bf16 %v4712_v30, %v4705_v29 }
 0x547   : > { %v3690_v56 = vmul.f32 %v8156_v55, %v8152_v33  ;;  %v4713_v33 = vand.u32 4294901760, %v4712_v30 }
 0x548   : > { %v3791_v63 = vand.u32 4294901760, %v3790_v58 }
 0x549   : > { %v3700_v59 = vsel %vm2263_vm3, %v3690_v56, 0  ;;  %v4714_v38 = vsub.f32 %v4712_v30, %v4713_v33  ;;  %v7781_v56 = vpack.c.bf16 %v4713_v33, %v4706_v31 }
 0x54a   : > { %v3769_v60 = vand.u32 4294901760, %v3700_v59  ;;  %v7736_v2 = vpack.c.bf16 %v3791_v63, %v3784_v62 }
 0x54b   : > { %v4715_v44 = vand.u32 4294901760, %v4714_v38 }
 0x54c   : > { %v3770_v61 = vsub.f32 %v3700_v59, %v3769_v60 }
 0x54d   : > { %v7772_v48 = vpack.c.bf16 %v4715_v44, %v4708_v43 }
 0x54e   : > { %v3771_v0 = vand.u32 4294901760, %v3770_v61 }
 0x550   : > { %v3772_v1 = vsub.f32 %v3770_v61, %v3771_v0 }
 0x552   : > { %v3773_v3 = vand.u32 4294901760, %v3772_v1 }
 0x554   : > { %7149 = vmatmul.mubr.f32.vlgmr.msra.gmra.mrb[6].mxu0 %v3773_v3 }
 0x555   : > { %7737 = vmatpush3.bf16.msra.mxu0 %v7736_v2  ;;  %7155 = vmatprep.mubr.msk.f32.mxu0 %vm8328_vm1, %v8329_v32 }
 0x556   : > { %7738 = vmatprep.subr.bf16.mxu0 %v8327_v27 }
 0x55c   : > { %7156 = vmatmul.mubr.f32.vlgmr.msra.gmra.mrb[6].mxu0 %v3769_v60 }
 0x55d   : > { %7740 = vmatpush3.bf16.msra.mxu0 %v7739_v4  ;;  %7162 = vmatprep.mubr.msk.f32.mxu0 %vm8328_vm1, %v8329_v32 }
 0x55e   : > { %7741 = vmatprep.subr.bf16.mxu0 %v8327_v27 }
 0x564   : > { %7163 = vmatmul.mubr.f32.vlgmr.msra.gmra.mrb[6].mxu0 %v3770_v61 }
 0x565   : > { %7743 = vmatpush3.bf16.msra.mxu0 %v7733_v51  ;;  %7169 = vmatprep.mubr.msk.f32.mxu0 %vm8328_vm1, %v8329_v32 }
 0x566   : > { %7744 = vmatprep.subr.bf16.mxu0 %v8327_v27 }
 0x56c   : > { %7170 = vmatmul.mubr.f32.vlgmr.msra.gmra.mrb[6].mxu0 %v3771_v0 }
 0x56d   : > { %7746 = vmatpush3.bf16.msra.mxu0 %v7745_v5  ;;  %7176 = vmatprep.mubr.msk.f32.mxu0 %vm8328_vm1, %v8329_v32 }
 0x56e   : > { %7747 = vmatprep.subr.bf16.mxu0 %v8327_v27 }
 0x574   : > { %7177 = vmatmul.mubr.f32.vlgmr.msra.gmra.mrb[6].mxu0 %v3769_v60 }
 0x575   : > { %7749 = vmatpush3.bf16.msra.mxu0 %v7733_v51  ;;  %7183 = vmatprep.mubr.msk.f32.mxu0 %vm8328_vm1, %v8329_v32  ;;  %v7769_v51 = vpack.c.bf16 %v4630_v28, %v4627_v26  ;;  %v6465_v28 = vld [vmem:[%s9395_s9] ss:$0 sm:$0xff] }
 0x576   : > { %7750 = vmatprep.subr.bf16.mxu0 %v8327_v27 }
 0x57c   : > { %7184 = vmatmul.mubr.f32.vlgmr.msra.gmra.mrb[6].mxu0 %v3769_v60 }
 0x57d   : > { %7190 = vmatprep.mubr.msk.f32.mxu0 %vm8328_vm1, %v8329_v32  ;;  %7752 = vmatpush3.bf16.msra.mxu0 %v7751_v21 }
 0x57e   : > { %7756 = vmatprep.subr.bf16.mxu0 %v8327_v27 }
 0x5ce   : > { %v3203_v18 = vpop.f32.mrb[4].mxu0 }
 0x5cf   : > { %v7101_v19 = vpop.f32.mrb[5].mxu0  ;;  %v4624_v41 = vsel %vm2263_vm3, %v3203_v18, 0 }
 0x5d0   : > { %v4693_v45 = vand.u32 4294901760, %v4624_v41 }
 0x5d2   : > { %v4694_v49 = vsub.f32 %v4624_v41, %v4693_v45  ;;  %v5122_v41 = vld [vmem:[#allocation7 + $0x8] sm:$0xff] }
 0x5d3   : > { %v5138_v44 = vand.u32 4294901760, %v5122_v41 }
 0x5d4   : > { %v4695_v52 = vand.u32 4294901760, %v4694_v49 }
 0x5d6   : > { %v4696_v53 = vsub.f32 %v4694_v49, %v4695_v52 }
 0x5d8   : > { %v4697_v55 = vand.u32 4294901760, %v4696_v53 }
 0x64f   : > { %v4157_v34 = vpop.f32.mrb[6].mxu0 }
 0x650   : > { %v4162_v35 = vsel %vm2263_vm3, %v4157_v34, 0  ;;  %v7185_v36 = vpop.f32.mrb[7].mxu0 }
 0x651   : > { %v4231_v40 = vand.u32 4294901760, %v4162_v35 }
 0x653   : > { %v4232_v42 = vsub.f32 %v4162_v35, %v4231_v40  ;;  %7198 = vmatmul.mubr.f32.vlgmr.msra.gmra.mrb[4].mxu1 %v4231_v40 }
 0x654   : > { %7761 = vmatpush3.bf16.msra.mxu1 %v7751_v21  ;;  %7211 = vmatprep.mubr.msk.f32.mxu1 %vm8328_vm1, %v8329_v32 }
 0x655   : > { %v4233_v46 = vand.u32 4294901760, %v4232_v42  ;;  %7765 = vmatprep.subr.bf16.mxu1 %v8327_v27 }
 0x657   : > { %v4234_v47 = vsub.f32 %v4232_v42, %v4233_v46  ;;  %7212 = vmatmul.mubr.f32.vlgmr.msra.gmra.mrb[6].mxu1 %v4233_v46 }
 0x658   : > { %7767 = vmatpush3.bf16.msra.mxu1 %v7751_v21  ;;  %7225 = vmatprep.mubr.msk.f32.mxu1 %vm8328_vm1, %v8329_v32 }
 0x659   : > { %v4235_v50 = vand.u32 4294901760, %v4234_v47  ;;  %7771 = vmatprep.subr.bf16.mxu1 %v8327_v27 }
 0x65b   : > { %7191 = vmatmul.mubr.f32.vlgmr.msra.gmra.mrb[8].mxu0 %v4235_v50  ;;  %7226 = vmatmul.mubr.f32.vlgmr.msra.gmra.mrb[8].mxu1 %v4231_v40 }
 0x65c   : > { %7758 = vmatpush3.bf16.msra.mxu0 %v7757_v22  ;;  %7773 = vmatpush3.bf16.msra.mxu1 %v7772_v48 }
 0x65d   : > { %7204 = vmatprep.mubr.msk.f32.mxu0 %vm8328_vm1, %v8329_v32  ;;  %7762 = vmatprep.subr.bf16.mxu0 %v8327_v27 }
 0x65e   : > { %7239 = vmatprep.mubr.msk.f32.mxu1 %vm8328_vm1, %v8329_v32  ;;  %7777 = vmatprep.subr.bf16.mxu1 %v8327_v27 }
 0x65f   : > { %7205 = vmatmul.mubr.f32.vlgmr.msra.gmra.mrb[10].mxu0 %v4232_v42  ;;  %7240 = vmatmul.mubr.f32.vlgmr.msra.gmra.mrb[10].mxu1 %v4693_v45  ;;  %v5123_v42 = vld [vmem:[#allocation7 + $0x10] sm:$0xff] }
 0x660   : > { %7764 = vmatpush3.bf16.msra.mxu0 %v7763_v23  ;;  %7779 = vmatpush3.bf16.msra.mxu1 %v7769_v51  ;;  %v5141_v46 = vand.u32 4294901760, %v5123_v42 }
 0x661   : > { %7218 = vmatprep.mubr.msk.f32.mxu0 %vm8328_vm1, %v8329_v32  ;;  %7768 = vmatprep.subr.bf16.mxu0 %v8327_v27 }
 0x662   : > { %7253 = vmatprep.mubr.msk.f32.mxu1 %vm8328_vm1, %v8329_v32  ;;  %7783 = vmatprep.subr.bf16.mxu1 %v8327_v27  ;;  %v5229_v50 = vsub.f32 %v5123_v42, %v5141_v46 }
 0x663   : > { %7219 = vmatmul.mubr.f32.vlgmr.msra.gmra.mrb[12].mxu0 %v4231_v40  ;;  %7254 = vmatmul.mubr.f32.vlgmr.msra.gmra.mrb[12].mxu1 %v4695_v52  ;;  %v5121_v40 = vld [vmem:[#allocation7] sm:$0xff] }
 0x664   : > { %7770 = vmatpush3.bf16.msra.mxu0 %v7769_v51  ;;  %7785 = vmatpush3.bf16.msra.mxu1 %v7769_v51  ;;  %v5135_v43 = vand.u32 4294901760, %v5121_v40 }
 0x665   : > { %7232 = vmatprep.mubr.msk.f32.mxu0 %vm8328_vm1, %v8329_v32  ;;  %7774 = vmatprep.subr.bf16.mxu0 %v8327_v27 }
 0x666   : > { %7267 = vmatprep.mubr.msk.f32.mxu1 %vm8328_vm1, %v8329_v32  ;;  %7822 = vmatprep.subr.bf16.mxu1 %v8327_v27  ;;  %v9003_v48 = vpack.c.bf16 %v5138_v44, %v5135_v43 }
 0x667   : > { %7233 = vmatmul.mubr.f32.vlgmr.msra.gmra.mrb[14].mxu0 %v4697_v55  ;;  %7268 = vmatmul.mubr.f32.vlgmr.msra.gmra.mrb[14].mxu1 %v4693_v45 }
 0x668   : > { %7776 = vmatpush3.bf16.msra.mxu0 %v7775_v54  ;;  %7246 = vmatprep.mubr.msk.f32.mxu0 %vm8328_vm1, %v8329_v32 }
 0x669   : > { %7780 = vmatprep.subr.bf16.mxu0 %v8327_v27  ;;  %7368 = vmatprep.mubr.msk.f32.mxu1 %vm8328_vm1, %v8329_v32 }
 0x66b   : > { %7247 = vmatmul.mubr.f32.vlgmr.msra.gmra.mrb[16].mxu0 %v4694_v49  ;;  %v5222_v49 = vsub.f32 %v5122_v41, %v5138_v44  ;;  %v5629_v41 = vld [vmem:[%s9400_s14 + $0x28] sm:$0xff] }
 0x66c   : > { %7782 = vmatpush3.bf16.msra.mxu0 %v7781_v56  ;;  %7260 = vmatprep.mubr.msk.f32.mxu0 %vm8328_vm1, %v8329_v32 }
 0x66d   : > { %7786 = vmatprep.subr.bf16.mxu0 %v8327_v27  ;;  %v5223_v54 = vand.u32 4294901760, %v5222_v49 }
 0x66f   : > { %7261 = vmatmul.mubr.f32.vlgmr.msra.gmra.mrb[18].mxu0 %v4693_v45  ;;  %v5124_v45 = vld [vmem:[#allocation7 + $0x18] sm:$0xff]  ;;  %v5224_v56 = vsub.f32 %v5222_v49, %v5223_v54 }
 0x670   : > { %7278 = vmatprep.mubr.msk.f32.mxu0 %vm8328_vm1, %v8329_v32  ;;  %v5144_v47 = vand.u32 4294901760, %v5124_v45  ;;  %7788 = vmatpush3.bf16.msra.mxu0 %v9003_v48 }
 0x671   : > { %7789 = vmatprep.subr.bf16.mxu0 %v8327_v27 }
 0x672   : > { %v5236_v51 = vsub.f32 %v5124_v45, %v5144_v47  ;;  %v9006_v52 = vpack.c.bf16 %v5144_v47, %v5141_v46  ;;  %v5630_v46 = vld [vmem:[%s9400_s14 + $0x30] sm:$0xff]  ;;  %v5631_v47 = vld [vmem:[%s9400_s14 + $0x38] sm:$0xff] }
 0x674   : > { %7791 = vmatpush3.bf16.msra.mxu0 %v9006_v52 }
 0x675   : > { %7792 = vmatprep.subr.bf16.mxu0 %v8327_v27 }
 0x726   : > { %v4318_v57 = vpop.f32.mrb[4].mxu1 }
 0x727   : > { %v7199_v58 = vpop.f32.mrb[5].mxu1 }
 0x728   : > { %v5225_v58 = vand.u32 4294901760, %v5224_v56 }
 0x72a   : > { %v4469_v59 = vpop.f32.mrb[6].mxu1 }
 0x72b   : > { %v7213_v60 = vpop.f32.mrb[7].mxu1 }
 0x72c   : > { %v5237_v60 = vand.u32 4294901760, %v5236_v51 }
 0x72e   : > { %v4237_v61 = vpop.f32.mrb[8].mxu0  ;;  %v4619_v62 = vpop.f32.mrb[8].mxu1 }
 0x72f   : > { %v4319_v63 = vadd.f32 %v4318_v57, %v4237_v61  ;;  %v7192_v0 = vpop.f32.mrb[9].mxu0  ;;  %v7227_v1 = vpop.f32.mrb[9].mxu1 }
 0x732   : > { %v4394_v2 = vpop.f32.mrb[10].mxu0  ;;  %v4780_v3 = vpop.f32.mrb[10].mxu1 }
 0x733   : > { %v4395_v4 = vadd.f32 %v4394_v2, %v4319_v63  ;;  %v7206_v5 = vpop.f32.mrb[11].mxu0  ;;  %v7241_v6 = vpop.f32.mrb[11].mxu1  ;;  %v5238_v63 = vsub.f32 %v5236_v51, %v5237_v60 }
 0x735   : > { %v4470_v7 = vadd.f32 %v4469_v59, %v4395_v4  ;;  %v5230_v59 = vand.u32 4294901760, %v5229_v50  ;;  %v5239_v1 = vand.u32 4294901760, %v5238_v63  ;;  %v7802_v4 = vpack.c.bf16 %v5236_v51, %v5229_v50 }
 0x736   : > { %v4546_v8 = vpop.f32.mrb[12].mxu0  ;;  %v4931_v9 = vpop.f32.mrb[12].mxu1 }
 0x737   : > { %v4547_v10 = vadd.f32 %v4546_v8, %v4470_v7  ;;  %v7220_v11 = vpop.f32.mrb[13].mxu0  ;;  %v7255_v12 = vpop.f32.mrb[13].mxu1  ;;  %v7814_v6 = vpack.c.bf16 %v5237_v60, %v5230_v59  ;;  %v5624_v7 = vld [vmem:[%s9400_s14] sm:$0xff]  ;;  %v5625_v8 = vld [vmem:[%s9400_s14 + $0x8] sm:$0xff] }
 0x739   : > { %v4620_v13 = vadd.f32 %v4619_v62, %v4547_v10  ;;  %v5231_v62 = vsub.f32 %v5229_v50, %v5230_v59  ;;  %v5650_v10 = vand.u32 4294901760, %v5625_v8 }
 0x73a   : > { %v4699_v14 = vpop.f32.mrb[14].mxu0  ;;  %v5081_v15 = vpop.f32.mrb[14].mxu1 }
 0x73b   : > { %v4700_v16 = vadd.f32 %v4699_v14, %v4620_v13  ;;  %v7234_v17 = vpop.f32.mrb[15].mxu0  ;;  %v7269_v18 = vpop.f32.mrb[15].mxu1  ;;  %v5232_v0 = vand.u32 4294901760, %v5231_v62  ;;  %v9019_v12 = vsub.f32 %v5625_v8, %v5650_v10  ;;  %v5635_v62 = vld [vmem:[%s9400_s14 + $0x58] sm:$0xff] }
 0x73c   : > { %v6466_v18 = vld [vmem:[%s9396_s10] ss:$0 sm:$0xff] }
 0x73d   : > { %v4781_v19 = vadd.f32 %v4780_v3, %v4700_v16  ;;  %v7796_v2 = vpack.c.bf16 %v5239_v1, %v5232_v0  ;;  %v5680_v1 = vand.u32 4294901760, %v5635_v62 }
 0x73e   : > { %v4856_v20 = vpop.f32.mrb[16].mxu0 }
 0x73f   : > { %v4857_v21 = vadd.f32 %v4856_v20, %v4781_v19  ;;  %v7248_v22 = vpop.f32.mrb[17].mxu0  ;;  %v6467_v20 = vld [vmem:[%s9397_s11] ss:$0 sm:$0xff] }
 0x741   : > { %v4932_v23 = vadd.f32 %v4931_v9, %v4857_v21  ;;  %v5647_v9 = vand.u32 4294901760, %v5624_v7 }
 0x742   : > { %v5008_v24 = vpop.f32.mrb[18].mxu0 }
 0x743   : > { %v5009_v25 = vadd.f32 %v5008_v24, %v4932_v23  ;;  %v7262_v26 = vpop.f32.mrb[19].mxu0  ;;  %v9017_v11 = vsub.f32 %v5624_v7, %v5647_v9  ;;  %v9021_v13 = vpack.c.bf16 %v5650_v10, %v5647_v9 }
 0x745   : > { %v5082_v29 = vadd.f32 %v5081_v15, %v5009_v25  ;;  %7824 = vmatpush3.bf16.msra.mxu1 %v9021_v13 }
 0x746   : > { %7825 = vmatprep.subr.bf16.mxu1 %v8327_v27 }
 0x747   : > { %v5091_v30 = vadd.f32 %v6465_v28, %v5082_v29 }
 0x749   : > { %v5092_v31 = vadd.f32 %v5091_v30, %v8784_v39  ;;  %v5215_v39 = vsub.f32 %v5121_v40, %v5135_v43  ;;  %v5626_v30 = vld [vmem:[%s9400_s14 + $0x10] sm:$0xff]  ;;  %v5628_v40 = vld [vmem:[%s9400_s14 + $0x20] sm:$0xff]  ;;  %v5662_v43 = vand.u32 4294901760, %v5629_v41 }
 0x74a   : > { %v5659_v42 = vand.u32 4294901760, %v5628_v40 }
 0x74b   : > { %v5093_v33 = vsel %vm1774_vm2, %v5092_v31, 0.0  ;;  %v5216_v53 = vand.u32 4294901760, %v5215_v39  ;;  %v7799_v3 = vpack.c.bf16 %v5222_v49, %v5215_v39  ;;  %v9085_v45 = vsub.f32 %v5629_v41, %v5662_v43 }
 0x74c   : > { %5094 = vadd.xlane.f32.xlu1 %v5093_v33  ;;  %v5653_v33 = vand.u32 4294901760, %v5626_v30  ;;  %v9083_v44 = vsub.f32 %v5628_v40, %v5659_v42  ;;  %v5668_v49 = vand.u32 4294901760, %v5631_v47 }
 0x74d   : > { %v5217_v55 = vsub.f32 %v5215_v39, %v5216_v53  ;;  %v7811_v5 = vpack.c.bf16 %v5223_v54, %v5216_v53  ;;  %v5665_v39 = vand.u32 4294901760, %v5630_v46  ;;  %v5632_v53 = vld [vmem:[%s9400_s14 + $0x40] sm:$0xff]  ;;  %v5633_v54 = vld [vmem:[%s9400_s14 + $0x48] sm:$0xff] }
 0x74e   : > { %v5671_v56 = vand.u32 4294901760, %v5632_v53 }
 0x74f   : > { %v5218_v57 = vand.u32 4294901760, %v5217_v55  ;;  %v9097_v51 = vsub.f32 %v5630_v46, %v5665_v39 }
 0x750   : > { %v9114_v59 = vsub.f32 %v5632_v53, %v5671_v56 }
 0x751   : > { %v7793_v61 = vpack.c.bf16 %v5225_v58, %v5218_v57  ;;  %v5674_v57 = vand.u32 4294901760, %v5633_v54  ;;  %v9112_v58 = vpack.c.bf16 %v5662_v43, %v5659_v42 }
 0x752   : > { %v5796_v43 = vand.u32 4294901760, %v9114_v59 }
 0x753   : > { %v9116_v60 = vsub.f32 %v5633_v54, %v5674_v57  ;;  %v9146_v10 = vpack.c.bf16 %v5674_v57, %v5671_v56 }
 0x754   : > { %v5797_v56 = vsub.f32 %v9114_v59, %v5796_v43 }
 0x755   : > { %v7883_v63 = vpack.c.bf16 %v9116_v60, %v9114_v59  ;;  %v5803_v46 = vand.u32 4294901760, %v9116_v60 }
 0x757   : > { %v5804_v57 = vsub.f32 %v9116_v60, %v5803_v46 }
 0x7d9   : > { %v5095_v34 = vpop.xlane.xlu1 %5094 }
 0x7da   : > { %v5097_v35 = vmul.f32 0.03125, %v5095_v34 }
 0x7dc   : > { %v5098_v36 = vsub.f32 %v5092_v31, %v5097_v35  ;;  %v5627_v31 = vld [vmem:[%s9400_s14 + $0x18] sm:$0xff]  ;;  %v7871_v35 = vpack.c.bf16 %v9019_v12, %v9017_v11 }
 0x7dd   : > { %v5656_v34 = vand.u32 4294901760, %v5627_v31 }
 0x7de   : > { %v5099_v37 = vmul.f32 %v5098_v36, %v5098_v36 }
 0x7df   : > { %v9095_v50 = vpack.c.bf16 %v5656_v34, %v5653_v33 }
 0x7e0   : > { %v5100_v38 = vsel %vm1774_vm2, %v5099_v37, 0.0  ;;  %v9068_v37 = vsub.f32 %v5627_v31, %v5656_v34 }
 0x7e1   : > { %5101 = vadd.xlane.f32.xlu0 %v5100_v38  ;;  %7827 = vmatpush3.bf16.msra.mxu1 %v9095_v50 }
 0x7e2   : > { %7828 = vmatprep.subr.bf16.mxu1 %v8327_v27 }
 0x7e5   : > { %7830 = vmatpush3.bf16.msra.mxu1 %v9112_v58 }
 0x7e6   : > { %7831 = vmatprep.subr.bf16.mxu1 %v8327_v27 }
 0x86e   : > { %v5102_v14 = vpop.xlane.xlu0 %5101 }
 0x86f   : > { %v5103_v15 = vmul.f32 0.03125, %v5102_v14 }
 0x871   : > { %v5104_v16 = vadd.f32 1e-12, %v5103_v15 }
 0x873   : > { %8157 = vrsqrt.f32 %v5104_v16  ;;  %v5638_v16 = vld [vmem:[%s9400_s14 + $0x70] sm:$0xff] }
 0x87d   : > { %v8158_v17 = vpop.eup %8157 }
 0x87e   : > { %v5106_v19 = vmul.f32 %v8158_v17, %v5098_v36  ;;  %v9066_v36 = vsub.f32 %v5626_v30, %v5653_v33  ;;  %v5639_v17 = vld [vmem:[%s9400_s14 + $0x78] sm:$0xff]  ;;  %v5775_v30 = vand.u32 4294901760, %v9085_v45  ;;  %v5782_v33 = vand.u32 4294901760, %v9097_v51 }
 0x880   : > { %v5113_v21 = vmul.f32 %v6466_v18, %v5106_v19  ;;  %v7874_v38 = vpack.c.bf16 %v9068_v37, %v9066_v36  ;;  %v5689_v19 = vand.u32 4294901760, %v5638_v16 }
 0x882   : > { %v9031_v22 = vadd.f32 %v6467_v20, %v5113_v21  ;;  %v5692_v20 = vand.u32 4294901760, %v5639_v17 }
 0x884   : > { %v5132_v23 = vsel %vm1774_vm2, %v9031_v22, 0 }
 0x885   : > { %v5203_v24 = vand.u32 4294901760, %v5132_v23 }
 0x887   : > { %v5204_v25 = vsub.f32 %v5132_v23, %v5203_v24  ;;  %v5837_v23 = vsub.f32 %v5638_v16, %v5689_v19 }
 0x889   : > { %v5205_v26 = vand.u32 4294901760, %v5204_v25  ;;  %v5838_v60 = vand.u32 4294901760, %v5837_v23 }
 0x88b   : > { %v5206_v28 = vsub.f32 %v5204_v25, %v5205_v26 }
 0x88d   : > { %v5207_v29 = vand.u32 4294901760, %v5206_v28  ;;  %v9173_v28 = vpack.c.bf16 %v5692_v20, %v5689_v19 }
 0x88f   : > { %7279 = vmatmul.mubr.f32.vlgmr.msra.gmra.mrb[20].mxu0 %v5207_v29  ;;  %v5768_v29 = vand.u32 4294901760, %v9083_v44 }
 0x890   : > { %7794 = vmatpush3.bf16.msra.mxu0 %v7793_v61  ;;  %7289 = vmatprep.mubr.msk.f32.mxu0 %vm8328_vm1, %v8329_v32  ;;  %v5634_v61 = vld [vmem:[%s9400_s14 + $0x50] sm:$0xff] }
 0x891   : > { %7795 = vmatprep.subr.bf16.mxu0 %v8327_v27  ;;  %v5677_v0 = vand.u32 4294901760, %v5634_v61  ;;  %v9179_v31 = vpack.c.bf16 %v5775_v30, %v5768_v29 }
 0x893   : > { %v9163_v21 = vpack.c.bf16 %v5680_v1, %v5677_v0 }
 0x894   : > { %7797 = vmatpush3.bf16.msra.mxu0 %v7796_v2  ;;  %v9129_v2 = vpack.c.bf16 %v5668_v49, %v5665_v39 }
 0x895   : > { %7798 = vmatprep.subr.bf16.mxu0 %v8327_v27 }
 0x896   : > { %7833 = vmatpush3.bf16.msra.mxu1 %v9129_v2 }
 0x897   : > { %7290 = vmatmul.mubr.f32.vlgmr.msra.gmra.mrb[20].mxu0 %v5203_v24  ;;  %7834 = vmatprep.subr.bf16.mxu1 %v8327_v27 }
 0x898   : > { %7800 = vmatpush3.bf16.msra.mxu0 %v7799_v3  ;;  %7300 = vmatprep.mubr.msk.f32.mxu0 %vm8328_vm1, %v8329_v32  ;;  %v9131_v3 = vsub.f32 %v5634_v61, %v5677_v0 }
 0x899   : > { %7801 = vmatprep.subr.bf16.mxu0 %v8327_v27 }
 0x89a   : > { %7836 = vmatpush3.bf16.msra.mxu1 %v9146_v10 }
 0x89b   : > { %7837 = vmatprep.subr.bf16.mxu1 %v8327_v27 }
 0x89c   : > { %7803 = vmatpush3.bf16.msra.mxu0 %v7802_v4  ;;  %v9133_v4 = vsub.f32 %v5635_v62, %v5680_v1 }
 0x89d   : > { %7804 = vmatprep.subr.bf16.mxu0 %v8327_v27 }
 0x89e   : > { %v7886_v7 = vpack.c.bf16 %v9133_v4, %v9131_v3  ;;  %7839 = vmatpush3.bf16.msra.mxu1 %v9163_v21 }
 0x89f   : > { %7301 = vmatmul.mubr.f32.vlgmr.msra.gmra.mrb[20].mxu0 %v5204_v25  ;;  %7840 = vmatprep.subr.bf16.mxu1 %v8327_v27 }
 0x8a0   : > { %7806 = vmatpush3.bf16.msra.mxu0 %v9003_v48  ;;  %7311 = vmatprep.mubr.msk.f32.mxu0 %vm8328_vm1, %v8329_v32 }
 0x8a1   : > { %7807 = vmatprep.subr.bf16.mxu0 %v8327_v27 }
 0x8a4   : > { %7809 = vmatpush3.bf16.msra.mxu0 %v9006_v52 }
 0x8a5   : > { %7810 = vmatprep.subr.bf16.mxu0 %v8327_v27 }
 0x8a7   : > { %7312 = vmatmul.mubr.f32.vlgmr.msra.gmra.mrb[20].mxu0 %v5205_v26 }
 0x8a8   : > { %7812 = vmatpush3.bf16.msra.mxu0 %v7811_v5  ;;  %7322 = vmatprep.mubr.msk.f32.mxu0 %vm8328_vm1, %v8329_v32  ;;  %v5636_v5 = vld [vmem:[%s9400_s14 + $0x60] sm:$0xff] }
 0x8a9   : > { %7813 = vmatprep.subr.bf16.mxu0 %v8327_v27  ;;  %v5683_v8 = vand.u32 4294901760, %v5636_v5 }
 0x8ab   : > { %v9148_v14 = vsub.f32 %v5636_v5, %v5683_v8 }
 0x8ac   : > { %7815 = vmatpush3.bf16.msra.mxu0 %v7814_v6  ;;  %v5637_v6 = vld [vmem:[%s9400_s14 + $0x68] sm:$0xff] }
 0x8ad   : > { %7816 = vmatprep.subr.bf16.mxu0 %v8327_v27  ;;  %v5686_v9 = vand.u32 4294901760, %v5637_v6  ;;  %v5824_v62 = vand.u32 4294901760, %v9148_v14 }
 0x8af   : > { %7323 = vmatmul.mubr.f32.vlgmr.msra.gmra.mrb[20].mxu0 %v5203_v24  ;;  %v9150_v15 = vsub.f32 %v5637_v6, %v5686_v9  ;;  %v9168_v26 = vpack.c.bf16 %v5686_v9, %v5683_v8  ;;  %v5825_v16 = vsub.f32 %v9148_v14, %v5824_v62 }
 0x8b0   : > { %7818 = vmatpush3.bf16.msra.mxu0 %v9003_v48  ;;  %7333 = vmatprep.mubr.msk.f32.mxu0 %vm8328_vm1, %v8329_v32  ;;  %v7877_v48 = vpack.c.bf16 %v9085_v45, %v9083_v44 }
 0x8b1   : > { %7819 = vmatprep.subr.bf16.mxu0 %v8327_v27  ;;  %v7889_v18 = vpack.c.bf16 %v9150_v15, %v9148_v14  ;;  %7842 = vmatpush3.bf16.msra.mxu1 %v9168_v26  ;;  %v5826_v19 = vand.u32 4294901760, %v5825_v16 }
 0x8b2   : > { %7843 = vmatprep.subr.bf16.mxu1 %v8327_v27 }
 0x8b4   : > { %7821 = vmatpush3.bf16.msra.mxu0 %v9006_v52  ;;  %v9099_v52 = vsub.f32 %v5631_v47, %v5668_v49  ;;  %v5783_v47 = vsub.f32 %v9097_v51, %v5782_v33  ;;  %v9193_v49 = vpack.c.bf16 %v5803_v46, %v5796_v43 }
 0x8b5   : > { %7870 = vmatprep.subr.bf16.mxu0 %v8327_v27  ;;  %7845 = vmatpush3.bf16.msra.mxu1 %v9173_v28 }
 0x8b6   : > { %v7880_v55 = vpack.c.bf16 %v9099_v52, %v9097_v51  ;;  %7846 = vmatprep.subr.bf16.mxu1 %v8327_v27  ;;  %v5789_v34 = vand.u32 4294901760, %v9099_v52  ;;  %v5784_v53 = vand.u32 4294901760, %v5783_v47  ;;  %v5798_v51 = vand.u32 4294901760, %v5797_v56 }
 0x8b7   : > { %7334 = vmatmul.mubr.f32.vlgmr.msra.gmra.mrb[20].mxu0 %v5203_v24  ;;  %v5844_v24 = vsub.f32 %v5639_v17, %v5692_v20  ;;  %v5839_v20 = vsub.f32 %v5837_v23, %v5838_v60 }
 0x8b8   : > { %7872 = vmatpush3.bf16.msra.mxu0 %v7871_v35  ;;  %7438 = vmatprep.mubr.msk.f32.mxu0 %vm8328_vm1, %v8329_v32  ;;  %v5769_v35 = vsub.f32 %v9083_v44, %v5768_v29  ;;  %v9185_v40 = vpack.c.bf16 %v5789_v34, %v5782_v33 }
 0x8b9   : > { %7873 = vmatprep.subr.bf16.mxu0 %v8327_v27  ;;  %v7892_v25 = vpack.c.bf16 %v5844_v24, %v5837_v23  ;;  %v5845_v9 = vand.u32 4294901760, %v5844_v24  ;;  %v5840_v29 = vand.u32 4294901760, %v5839_v20  ;;  %v5740_v23 = vand.u32 4294901760, %v9017_v11 }
 0x8ba   : > { %v5770_v41 = vand.u32 4294901760, %v5769_v35 }
 0x8bb   : > { %v5741_v47 = vsub.f32 %v9017_v11, %v5740_v23 }
 0x8bc   : > { %7875 = vmatpush3.bf16.msra.mxu0 %v7874_v38  ;;  %v5776_v38 = vsub.f32 %v9085_v45, %v5775_v30  ;;  %v5810_v45 = vand.u32 4294901760, %v9131_v3 }
 0x8bd   : > { %7876 = vmatprep.subr.bf16.mxu0 %v8327_v27 }
 0x8be   : > { %v5777_v42 = vand.u32 4294901760, %v5776_v38  ;;  %v5811_v0 = vsub.f32 %v9131_v3, %v5810_v45 }
 0x8c0   : > { %7878 = vmatpush3.bf16.msra.mxu0 %v7877_v48  ;;  %v5790_v48 = vsub.f32 %v9099_v52, %v5789_v34  ;;  %v9191_v39 = vpack.c.bf16 %v5777_v42, %v5770_v41  ;;  %v5805_v52 = vand.u32 4294901760, %v5804_v57  ;;  %v6468_v34 = vld [vmem:[%s9453_s18] ss:$0 sm:$0xff]  ;;  %v5742_v57 = vand.u32 4294901760, %v5741_v47 }
 0x8c1   : > { %7879 = vmatprep.subr.bf16.mxu0 %v8327_v27 }
 0x8c2   : > { %v5791_v44 = vand.u32 4294901760, %v5790_v48  ;;  %v9207_v5 = vpack.c.bf16 %v5805_v52, %v5798_v51 }
 0x8c4   : > { %7881 = vmatpush3.bf16.msra.mxu0 %v7880_v55  ;;  %v9195_v54 = vpack.c.bf16 %v5791_v44, %v5784_v53  ;;  %v5817_v55 = vand.u32 4294901760, %v9133_v4 }
 0x8c5   : > { %7882 = vmatprep.subr.bf16.mxu0 %v8327_v27 }
 0x8c6   : > { %v9201_v61 = vpack.c.bf16 %v5817_v55, %v5810_v45  ;;  %v5818_v1 = vsub.f32 %v9133_v4, %v5817_v55  ;;  %v5846_v4 = vsub.f32 %v5844_v24, %v5845_v9  ;;  %v5747_v24 = vand.u32 4294901760, %v9019_v12 }
 0x8c7   : > { %v5754_v45 = vand.u32 4294901760, %v9066_v36  ;;  %v5761_v55 = vand.u32 4294901760, %v9068_v37 }
 0x8c8   : > { %7884 = vmatpush3.bf16.msra.mxu0 %v7883_v63  ;;  %v5831_v63 = vand.u32 4294901760, %v9150_v15  ;;  %v5819_v59 = vand.u32 4294901760, %v5818_v1  ;;  %v5847_v30 = vand.u32 4294901760, %v5846_v4  ;;  %v5748_v48 = vsub.f32 %v9019_v12, %v5747_v24 }
 0x8c9   : > { %7885 = vmatprep.subr.bf16.mxu0 %v8327_v27  ;;  %v7919_v44 = vpack.c.bf16 %v5747_v24, %v5740_v23  ;;  %v5755_v52 = vsub.f32 %v9066_v36, %v5754_v45  ;;  %v7922_v12 = vpack.c.bf16 %v5761_v55, %v5754_v45 }
 0x8ca   : > { %v9209_v6 = vpack.c.bf16 %v5831_v63, %v5824_v62  ;;  %v5832_v17 = vsub.f32 %v9150_v15, %v5831_v63  ;;  %v9219_v33 = vpack.c.bf16 %v5847_v30, %v5840_v29  ;;  %v5749_v51 = vand.u32 4294901760, %v5748_v48  ;;  %v6471_v30 = vld [vmem:[%s9457_s27] ss:$0 sm:$0xff] }
 0x8cb   : > { %v5762_v62 = vsub.f32 %v9068_v37, %v5761_v55  ;;  %v5756_v1 = vand.u32 4294901760, %v5755_v52 }
 0x8cc   : > { %7887 = vmatpush3.bf16.msra.mxu0 %v7886_v7  ;;  %v5812_v7 = vand.u32 4294901760, %v5811_v0  ;;  %v5833_v3 = vand.u32 4294901760, %v5832_v17  ;;  %v7847_v0 = vpack.c.bf16 %v5749_v51, %v5742_v57 }
 0x8cd   : > { %7888 = vmatprep.subr.bf16.mxu0 %v8327_v27 }
 0x8ce   : > { %v9211_v8 = vpack.c.bf16 %v5819_v59, %v5812_v7  ;;  %v5763_v7 = vand.u32 4294901760, %v5762_v62 }
 0x8d0   : > { %7890 = vmatpush3.bf16.msra.mxu0 %v7889_v18  ;;  %v9215_v18 = vpack.c.bf16 %v5845_v9, %v5838_v60  ;;  %v7850_v36 = vpack.c.bf16 %v5763_v7, %v5756_v1 }
 0x8d1   : > { %7891 = vmatprep.subr.bf16.mxu0 %v8327_v27 }
 0x8d4   : > { %7893 = vmatpush3.bf16.msra.mxu0 %v7892_v25  ;;  %v9217_v25 = vpack.c.bf16 %v5833_v3, %v5826_v19 }
 0x8d5   : > { %7918 = vmatprep.subr.bf16.mxu0 %v8327_v27 }
 0x98a   : > { %v5615_v35 = vpop.f32.mrb[20].mxu0 }
 0x98b   : > { %v7992_v14 = vadd.f32 %v6468_v34, %v5615_v35  ;;  %v7335_v38 = vpop.f32.mrb[21].mxu0 }
 0x98d   : > { %v5620_v15 = vmul.f32 0.70710677, %v7992_v14  ;;  %v5619_v42 = vmul.f32 0.5, %v7992_v14 }
 0x98f   : > { %8159 = verf.f32 %v5620_v15 }
 0x999   : > { %v8160_v41 = vpop.eup %8159 }
 0x99a   : > { %v5622_v43 = vadd.f32 1.0, %v8160_v41 }
 0x99c   : > { %v5623_v46 = vmul.f32 %v5622_v43, %v5619_v42 }
 0x99e   : > { %v9228_v53 = vand.u32 4294901760, %v5623_v46 }
 0x9a0   : > { %v9233_v56 = vsub.f32 %v5623_v46, %v9228_v53 }
 0x9a2   : > { %7439 = vmatmul.mubr.f32.vlgmr.msra.gmra.mrb[22].mxu0 %v9233_v56  ;;  %v5729_v11 = vand.u32 4294901760, %v9233_v56 }
 0x9a3   : > { %7920 = vmatpush3.bf16.msra.mxu0 %v7919_v44  ;;  %7508 = vmatprep.mubr.msk.f32.mxu0 %vm8328_vm1, %v8329_v32 }
 0x9a4   : > { %7921 = vmatprep.subr.bf16.mxu0 %v8327_v27  ;;  %v5730_v63 = vsub.f32 %v9233_v56, %v5729_v11 }
 0x9a6   : > { %v5731_v59 = vand.u32 4294901760, %v5730_v63 }
 0x9a7   : > { %7923 = vmatpush3.bf16.msra.mxu0 %v7922_v12 }
 0x9a8   : > { %7369 = vmatmul.mubr.f32.vlgmr.msra.gmra.mrb[16].mxu1 %v5731_v59  ;;  %7924 = vmatprep.subr.bf16.mxu0 %v8327_v27 }
 0x9a9   : > { %7848 = vmatpush3.bf16.msra.mxu1 %v7847_v0  ;;  %7403 = vmatprep.mubr.msk.f32.mxu1 %vm8328_vm1, %v8329_v32 }
 0x9aa   : > { %7849 = vmatprep.subr.bf16.mxu1 %v8327_v27 }
 0x9ab   : > { %7926 = vmatpush3.bf16.msra.mxu0 %v9179_v31 }
 0x9ac   : > { %7927 = vmatprep.subr.bf16.mxu0 %v8327_v27 }
 0x9ad   : > { %7851 = vmatpush3.bf16.msra.mxu1 %v7850_v36 }
 0x9ae   : > { %7852 = vmatprep.subr.bf16.mxu1 %v8327_v27 }
 0x9af   : > { %7929 = vmatpush3.bf16.msra.mxu0 %v9185_v40 }
 0x9b0   : > { %7930 = vmatprep.subr.bf16.mxu0 %v8327_v27 }
 0x9b1   : > { %7854 = vmatpush3.bf16.msra.mxu1 %v9191_v39 }
 0x9b2   : > { %7855 = vmatprep.subr.bf16.mxu1 %v8327_v27 }
 0x9b3   : > { %7932 = vmatpush3.bf16.msra.mxu0 %v9193_v49 }
 0x9b4   : > { %7933 = vmatprep.subr.bf16.mxu0 %v8327_v27 }
 0x9b5   : > { %7857 = vmatpush3.bf16.msra.mxu1 %v9195_v54 }
 0x9b6   : > { %7858 = vmatprep.subr.bf16.mxu1 %v8327_v27 }
 0x9b7   : > { %7935 = vmatpush3.bf16.msra.mxu0 %v9201_v61 }
 0x9b8   : > { %7936 = vmatprep.subr.bf16.mxu0 %v8327_v27 }
 0x9b9   : > { %7860 = vmatpush3.bf16.msra.mxu1 %v9207_v5 }
 0x9ba   : > { %7861 = vmatprep.subr.bf16.mxu1 %v8327_v27 }
 0x9bb   : > { %7938 = vmatpush3.bf16.msra.mxu0 %v9209_v6 }
 0x9bc   : > { %7939 = vmatprep.subr.bf16.mxu0 %v8327_v27 }
 0x9bd   : > { %7863 = vmatpush3.bf16.msra.mxu1 %v9211_v8 }
 0x9be   : > { %7864 = vmatprep.subr.bf16.mxu1 %v8327_v27 }
 0x9bf   : > { %7941 = vmatpush3.bf16.msra.mxu0 %v9215_v18 }
 0x9c1   : > { %7866 = vmatpush3.bf16.msra.mxu1 %v9217_v25  ;;  %v6470_v25 = vld [vmem:[%s9456_s13] ss:$0 sm:$0xff]  ;;  %s8225_s13 = scalar_lea.vmem %s8224_s19, 256 }
 0x9c2   : > { %7509 = vmatmul.mubr.f32.vlgmr.msra.gmra.mrb[24].mxu0 %v9228_v53  ;;  %7867 = vmatprep.subr.bf16.mxu1 %v8327_v27  ;;  %p8227_p7 = scmp.lt.s32.totalorder %s8225_s13, %s8219_s17 }
 0x9c4   : > { %p8228_p9 = por %p8227_p7, %p8226_p6 }
 0x9c5   : > { %7869 = vmatpush3.bf16.msra.mxu1 %v9219_v33 }
 0x9c6   : > { %7894 = vmatprep.subr.bf16.mxu1 %v8327_v27  ;;  %p8229_p11 = pnand %p8228_p9, %p8222_p5 }
 0x9c8   : > { %7404 = vmatmul.mubr.f32.vlgmr.msra.gmra.mrb[18].mxu1 %v9228_v53 }
 0x9c9   : > { %7896 = vmatpush3.bf16.msra.mxu1 %v9021_v13  ;;  %7473 = vmatprep.mubr.msk.f32.mxu1 %vm8328_vm1, %v8329_v32 }
 0x9ca   : > { %7897 = vmatprep.subr.bf16.mxu1 %v8327_v27 }
 0x9cd   : > { %7899 = vmatpush3.bf16.msra.mxu1 %v9095_v50 }
 0x9ce   : > { %7900 = vmatprep.subr.bf16.mxu1 %v8327_v27 }
 0x9d1   : > { %7902 = vmatpush3.bf16.msra.mxu1 %v9112_v58 }
 0x9d2   : > { %7903 = vmatprep.subr.bf16.mxu1 %v8327_v27 }
 0x9d5   : > { %7905 = vmatpush3.bf16.msra.mxu1 %v9129_v2 }
 0x9d6   : > { %7906 = vmatprep.subr.bf16.mxu1 %v8327_v27 }
 0x9d9   : > { %7908 = vmatpush3.bf16.msra.mxu1 %v9146_v10 }
 0x9da   : > { %7909 = vmatprep.subr.bf16.mxu1 %v8327_v27 }
 0x9dd   : > { %7911 = vmatpush3.bf16.msra.mxu1 %v9163_v21 }
 0x9de   : > { %7912 = vmatprep.subr.bf16.mxu1 %v8327_v27 }
 0x9e1   : > { %7914 = vmatpush3.bf16.msra.mxu1 %v9168_v26 }
 0x9e2   : > { %7915 = vmatprep.subr.bf16.mxu1 %v8327_v27 }
 0x9e5   : > { %7917 = vmatpush3.bf16.msra.mxu1 %v9173_v28 }
 0x9e6   : > { %7942 = vmatprep.subr.bf16.mxu1 %v8327_v27 }
 0x9e8   : > { %7474 = vmatmul.mubr.f32.vlgmr.msra.gmra.mrb[20].mxu1 %v5729_v11 }
 0x9e9   : > { %7944 = vmatpush3.bf16.msra.mxu1 %v9021_v13  ;;  %7543 = vmatprep.mubr.msk.f32.mxu1 %vm8328_vm1, %v8329_v32 }
 0x9ea   : > { %7945 = vmatprep.subr.bf16.mxu1 %v8327_v27 }
 0x9ed   : > { %7947 = vmatpush3.bf16.msra.mxu1 %v9095_v50 }
 0x9ee   : > { %7948 = vmatprep.subr.bf16.mxu1 %v8327_v27 }
 0x9f1   : > { %7950 = vmatpush3.bf16.msra.mxu1 %v9112_v58 }
 0x9f2   : > { %7951 = vmatprep.subr.bf16.mxu1 %v8327_v27 }
 0x9f5   : > { %7953 = vmatpush3.bf16.msra.mxu1 %v9129_v2 }
 0x9f6   : > { %7954 = vmatprep.subr.bf16.mxu1 %v8327_v27 }
 0x9f9   : > { %7956 = vmatpush3.bf16.msra.mxu1 %v9146_v10  ;;  %v6469_v10 = vld [vmem:[%s9454_s21] ss:$0 sm:$0xff]  ;;  %s9328_s21 = scalar_lea.hbm %s9458_s0, %s6474_s24 }
 0x9fa   : > { %7957 = vmatprep.subr.bf16.mxu1 %v8327_v27 }
 0x9fd   : > { %7959 = vmatpush3.bf16.msra.mxu1 %v9163_v21 }
 0x9fe   : > { %7960 = vmatprep.subr.bf16.mxu1 %v8327_v27 }
 0xa01   : > { %7962 = vmatpush3.bf16.msra.mxu1 %v9168_v26 }
 0xa02   : > { %7963 = vmatprep.subr.bf16.mxu1 %v8327_v27 }
 0xa05   : > { %7965 = vmatpush3.bf16.msra.mxu1 %v9173_v28 }
 0xa08   : > { %7544 = vmatmul.mubr.f32.vlgmr.msra.gmra.mrb[22].mxu1 %v9228_v53 }
 0xa75   : > { %v5988_v32 = vpop.f32.mrb[22].mxu0 }
 0xa76   : > { %v7440_v13 = vpop.f32.mrb[23].mxu0 }
 0xa7b   : > { %v5733_v37 = vpop.f32.mrb[16].mxu1 }
 0xa7c   : > { %v7370_v50 = vpop.f32.mrb[17].mxu1  ;;  %v5734_v21 = vadd.f32 %v6469_v10, %v5733_v37 }
 0xa95   : > { %v6196_v58 = vpop.f32.mrb[24].mxu0 }
 0xa96   : > { %v7510_v2 = vpop.f32.mrb[25].mxu0 }
 0xa9b   : > { %v5884_v31 = vpop.f32.mrb[18].mxu1 }
 0xa9c   : > { %v5885_v40 = vadd.f32 %v5884_v31, %v5734_v21  ;;  %v7405_v26 = vpop.f32.mrb[19].mxu1 }
 0xa9e   : > { %v5989_v39 = vadd.f32 %v5988_v32, %v5885_v40 }
 0xabb   : > { %v6077_v27 = vpop.f32.mrb[20].mxu1 }
 0xabc   : > { %v6078_v49 = vadd.f32 %v6077_v27, %v5989_v39  ;;  %v7475_v28 = vpop.f32.mrb[21].mxu1 }
 0xabe   : > { %v6197_v54 = vadd.f32 %v6196_v58, %v6078_v49 }
 0xadb   : > { %v6283_v61 = vpop.f32.mrb[22].mxu1 }
 0xadc   : > { %v6284_v5 = vadd.f32 %v6283_v61, %v6197_v54  ;;  %v7545_v6 = vpop.f32.mrb[23].mxu1 }
 0xade   : > { %v6287_v8 = vadd.f32 %v6284_v5, %v9031_v22 }
 0xae0   : > { %v6288_v60 = vsel %vm1774_vm2, %v6287_v8, 0.0 }
 0xae1   : > { %6289 = vadd.xlane.f32.xlu0 %v6288_v60 }
 0xb6e   : > { %v6290_v9 = vpop.xlane.xlu0 %6289 }
 0xb6f   : > { %v6291_v16 = vmul.f32 0.03125, %v6290_v9 }
 0xb71   : > { %v6292_v17 = vsub.f32 %v6287_v8, %v6291_v16 }
 0xb73   : > { %v6293_v18 = vmul.f32 %v6292_v17, %v6292_v17 }
 0xb75   : > { %v6294_v19 = vsel %vm1774_vm2, %v6293_v18, 0.0 }
 0xb76   : > { %6295 = vadd.xlane.f32.xlu1 %v6294_v19 }
 0xc03   : > { %v6296_v3 = vpop.xlane.xlu1 %6295 }
 0xc04   : > { %v6297_v20 = vmul.f32 0.03125, %v6296_v3 }
 0xc06   : > { %v6298_v4 = vadd.f32 1e-12, %v6297_v20 }
 0xc08   : > { %8161 = vrsqrt.f32 %v6298_v4 }
 0xc12   : > { %v8162_v22 = vpop.eup %8161 }
 0xc13   : > { %v6300_v29 = vmul.f32 %v8162_v22, %v6292_v17 }
 0xc15   : > { %v6307_v33 = vmul.f32 %v6470_v25, %v6300_v29 }
 0xc17   : > { %v6314_v34 = vadd.f32 %v6471_v30, %v6307_v33 }
 0xc19   : > { %6315 = vst.msk [vmem:[%s635_s26] sm:$0xff] %vm1774_vm2, %v6314_v34 }
 0xc1a   : > { %8232 = shalt.err (!%p8229_p11)
}
 0xc1b   : > { %s8233_s15 = scalar_lea.hbm %s9328_s21, 128  ;;  %s8237_s25 = scalar_lea.hbm %s9459_s23, 512 }
 0xc1c   : > { %p8234_p13 = scmp.ne.s32.totalorder %s9328_s21, %s8233_s15  ;;  %p8238_p0 = scmp.lt.u32.totalorder %s9328_s21, %s9459_s23 }
 0xc1d   : > { %p8239_p2 = scmp.lt.u32.totalorder %s8237_s25, %s8233_s15  ;;  %p8241_p12 = scmp.lt.u32.totalorder %s8233_s15, %s9328_s21 }
 0xc1e   : > { %p8235_p3 = pnand %p8234_p13, %p9461_p1 }
 0xc1f   : > { %p8240_p10 = por %p8239_p2, %p8238_p0 }
 0xc20   : > { %p8236_p8 = pneg %p8235_p3 }
 0xc21   : > { %p8242_p4 = por %p8241_p12, %p8240_p10 }
 0xc23   : > { %p8243_p5 = pnand %p8242_p4, %p8236_p8 }
 0xc25   : > { %8246 = shalt.err (!%p8243_p5)
}
 0xc26   : > { %8059 = dma.vmem_to_hbm [thread:$0]  (%p9461_p1), %s9330_s22, 128, %s9328_s21, %s6317_s2  }
 0xc27 PF: > { %s9462_s18 = sld [smem:[#allocation17_spill]]  ;;  %s9463_s20 = sld [smem:[#allocation13_spill]] }
 0xc28   : > { %s9464_s0 = sld [smem:[#allocation21_spill]] }
 0xc2d   : > { %p8076_p6 = scmp.ge.s32.totalorder %s9462_s18, 2  ;;  %s6344_s30 = sand.u32 1, %s9463_s20  }
 0xc2e   : > { %p9465_p7 = scmp.ne.s32.totalorder %s9464_s0, 0  ;;  %s6345_s17 = scalar_lea.sflag [#allocation6], %s6344_s30 }
 0xc30   : > { %p8069_p9 = pnand %p8076_p6, %p9465_p7 }
 0xc32   : > { %8288 = dma.done.wait (!%p8069_p9), %s6345_s17, 128  }
 0xc33   : > { %8290 = vsyncadd (!%p8069_p9), %s6345_s17, 4294967168  ;;  %s33_s20 = sadd.s32 1, %s9462_s18   ;;  %s9466_s1 = sld [smem:[#allocation14_spill]] }
 0xc34   : > { %p30_p11 = scmp.ge.s32.totalorder %s33_s20, 6   ;;  %s9467_s29 = sld [smem:[#allocation22_spill]] }
 0xc35   : > { %s9468_s30 = sld [smem:[#allocation15_spill]]  ;;  %s9469_s0 = sld [smem:[#allocation16_spill]] }
 0xc36   : > { %s9470_s19 = sld [smem:[#allocation18_spill]]  ;;  %s9471_s22 = sld [smem:[#allocation20_spill]] }
 0xc37   : > { %s9472_s27 = smov %s8297_s28  ;;  %32 = sbr.rel (!%p30_p11) target bundleno = 17 (0x11), region = 144 }
 0xc39   : > { %s9473_s28 = smov %s9466_s1 }
 0xc3c   : > { %s9474_s1 = smov %s9471_s22 }
 0xc3e   :  { %6350 = vsyncpa [#allocation5], 1 }
 0xc3f   :  { %6352 = vsyncpa [#allocation5 + $0x1], 1 }
 0xc40   :  { %6353 = vsyncpa [#allocation8], 1 }
 0xc41   :  { %6354 = vsyncpa [#allocation6], 1 }
 0xc42   :  { %6356 = vsyncpa [#allocation6 + $0x1], 1 }

</bundles_post_ra>
